<compile_context>
chip_gen: v6e
topology: v6e:2x2x1
jax: 0.10.0
libtpu: 0.0.40
codegen_flags: <defaults>
</compile_context>

<pallas_src>
import functools
import math

import jax
import jax.numpy as jnp
from jax.experimental import pallas as pl
from jax.experimental.pallas import tpu as pltpu  # noqa: F401  (TPU backend)

# --------------------------------------------------------------------------
# Small synthetic "CodeBERT" config (same topology as RoBERTa, tiny shapes).
# --------------------------------------------------------------------------
CONFIG = dict(
    vocab_size=128,
    max_position=64,
    hidden=32,
    num_heads=2,
    intermediate=64,
    num_layers=2,
    num_labels=4,
    seq_len=8,
    batch=2,
    pad_token_id=1,
    layer_norm_eps=1e-5,
)

MASK_BIAS = -1e9  # additive bias for masked key positions


# --------------------------------------------------------------------------
# In-kernel helpers (pure jnp / lax, traced inside the Pallas kernel body).
# --------------------------------------------------------------------------
def _layer_norm(x, gamma, beta, eps):
    mean = jnp.mean(x, axis=-1, keepdims=True)
    var = jnp.mean((x - mean) ** 2, axis=-1, keepdims=True)
    return (x - mean) * jax.lax.rsqrt(var + eps) * gamma + beta


def _gelu_exact(x):
    # exact (erf-based) GELU, as used by RoBERTa / CodeBERT ("gelu" act)
    return 0.5 * x * (1.0 + jax.lax.erf(x * (1.0 / math.sqrt(2.0))))


# --------------------------------------------------------------------------
# Fused Pallas kernel: embedding LayerNorm, all encoder layers (statically
# unrolled), pooler + classifier — one kernel invocation, no grid.
# --------------------------------------------------------------------------
def codebert_fused_kernel(emb_ref, bias_ref, eln_g_ref, eln_b_ref,
                          wqkv_ref, bqkv_ref, wo_ref, bo_ref,
                          ln1g_ref, ln1b_ref, w1_ref, b1_ref,
                          w2_ref, b2_ref, ln2g_ref, ln2b_ref,
                          wp_ref, bp_ref, wc_ref, bc_ref,
                          out_ref,
                          *, batch, seq, num_heads, num_layers, eps):
    BS = batch * seq
    bias = bias_ref[...]                               # [B*nh, 1, S]

    # ---- embedding LayerNorm ----------------------------------------------
    x = _layer_norm(emb_ref[...], eln_g_ref[...], eln_b_ref[...], eps)  # [BS,H]
    H = x.shape[-1]
    hd = H // num_heads
    scale = 1.0 / math.sqrt(hd)

    def split_heads(t):   # [B*S, H] -> [B*nh, S, hd]
        return (t.reshape(batch, seq, num_heads, hd)
                 .transpose(0, 2, 1, 3)
                 .reshape(batch * num_heads, seq, hd))

    def merge_heads(t):   # [B*nh, S, hd] -> [B*S, H]
        return (t.reshape(batch, num_heads, seq, hd)
                 .transpose(0, 2, 1, 3)
                 .reshape(BS, H))

    # ---- encoder layers, statically unrolled --------------------------------
    for l in range(num_layers):
        # fused QKV projection: one wide matmul per layer
        qkv = (jnp.dot(x, wqkv_ref[l], preferred_element_type=jnp.float32)
               + bqkv_ref[l])
        q = split_heads(qkv[:, 0 * H:1 * H] * scale)   # fold 1/sqrt(hd) into q
        k = split_heads(qkv[:, 1 * H:2 * H])
        v = split_heads(qkv[:, 2 * H:3 * H])

        # attention batched over (batch * head) — single einsum per matmul
        scores = jnp.einsum('bqd,bkd->bqk', q, k,
                            preferred_element_type=jnp.float32) + bias
        scores = scores - jnp.max(scores, axis=-1, keepdims=True)
        p = jnp.exp(scores)
        # approx reciprocal (EUP slot); ~1e-3 rel. deviation vs exact softmax
        p = p * pl.reciprocal(jnp.sum(p, axis=-1, keepdims=True), approx=True)
        ctx = merge_heads(jnp.einsum('bqk,bkd->bqd', p, v,
                                     preferred_element_type=jnp.float32))

        # attention output projection + residual + LayerNorm
        attn_out = (jnp.dot(ctx, wo_ref[l], preferred_element_type=jnp.float32)
                    + bo_ref[l])
        x1 = _layer_norm(x + attn_out, ln1g_ref[l], ln1b_ref[l], eps)

        # GELU FFN + residual + LayerNorm
        ffn = _gelu_exact(
            jnp.dot(x1, w1_ref[l], preferred_element_type=jnp.float32)
            + b1_ref[l])
        ffn = (jnp.dot(ffn, w2_ref[l], preferred_element_type=jnp.float32)
               + b2_ref[l])
        x = _layer_norm(x1 + ffn, ln2g_ref[l], ln2b_ref[l], eps)

    # ---- pooler (tanh on [CLS]) + classifier ---------------------------------
    cls = x.reshape(batch, seq, H)[:, 0, :]            # [B, H]
    pooled = jnp.tanh(
        jnp.dot(cls, wp_ref[...], preferred_element_type=jnp.float32)
        + bp_ref[...])
    # Dropout(p=0.1) between pooler and classifier is identity at inference
    out_ref[...] = (jnp.dot(pooled, wc_ref[...],
                            preferred_element_type=jnp.float32)
                    + bc_ref[...])


# --------------------------------------------------------------------------
# Wrapper: embeddings (plain-JAX gathers) + one grid-less pallas_call for
# everything else. All inputs/outputs are whole-array VMEM blocks.
# --------------------------------------------------------------------------
def codebert_classifier_forward(params, input_ids, attention_mask, cfg):
    B, S = input_ids.shape
    H = cfg["hidden"]
    nh = cfg["num_heads"]
    NL = cfg["num_labels"]

    mask = attention_mask.astype(jnp.int32)
    # RoBERTa position ids: pad_token_id + cumsum(mask) * mask
    position_ids = jnp.cumsum(mask, axis=1) * mask + cfg["pad_token_id"]

    emb = (params["word_emb"][input_ids]
           + params["pos_emb"][position_ids]
           + params["type_emb"][jnp.zeros_like(input_ids)])
    emb2d = emb.reshape(B * S, H).astype(jnp.float32)  # LayerNorm happens in-kernel

    # additive attention-mask bias, pre-broadcast per (batch, head): [B*nh, 1, S]
    mask_bias = ((1.0 - attention_mask.astype(jnp.float32))
                 * MASK_BIAS)[:, None, :]
    mask_bias = jnp.repeat(mask_bias, nh, axis=0)

    stk = params["stacked"]

    kern = functools.partial(codebert_fused_kernel,
                             batch=B, seq=S, num_heads=nh,
                             num_layers=cfg["num_layers"],
                             eps=cfg["layer_norm_eps"])

    logits = pl.pallas_call(
        kern,
        out_shape=jax.ShapeDtypeStruct((B, NL), jnp.float32),
    )(emb2d, mask_bias,
      params["emb_ln_g"], params["emb_ln_b"],
      stk["wqkv"], stk["bqkv"], stk["wo"], stk["bo"],
      stk["ln1_g"], stk["ln1_b"], stk["w1"], stk["b1"],
      stk["w2"], stk["b2"], stk["ln2_g"], stk["ln2_b"],
      params["pooler_w"], params["pooler_b"],
      params["cls_w"], params["cls_b"])
    return logits


# --------------------------------------------------------------------------
# Deterministic parameter init (synthetic; no checkpoint loading).
# Per-layer weights are stacked along a leading layer axis, Wq/Wk/Wv fused.
# --------------------------------------------------------------------------
def init_params(key, cfg):
    H, I = cfg["hidden"], cfg["intermediate"]
    L, NL = cfg["num_layers"], cfg["num_labels"]

    def nrm(k, shape, scale=0.02):
        return (scale * jax.random.normal(k, shape)).astype(jnp.float32)

    keys = iter(jax.random.split(key, 16))
    params = dict(
        word_emb=nrm(next(keys), (cfg["vocab_size"], H)),
        pos_emb=nrm(next(keys), (cfg["max_position"], H)),
        type_emb=nrm(next(keys), (1, H)),
        emb_ln_g=jnp.ones((1, H), jnp.float32),
        emb_ln_b=jnp.zeros((1, H), jnp.float32),
        pooler_w=nrm(next(keys), (H, H)),
        pooler_b=jnp.zeros((1, H), jnp.float32),
        cls_w=nrm(next(keys), (H, NL)),
        cls_b=jnp.zeros((1, NL), jnp.float32),
    )
    kq, kk, kv, ko, k1, k2 = jax.random.split(next(keys), 6)
    wq, wk, wv = nrm(kq, (L, H, H)), nrm(kk, (L, H, H)), nrm(kv, (L, H, H))
    params["stacked"] = dict(
        wqkv=jnp.concatenate([wq, wk, wv], axis=-1),      # [L, H, 3H]
        bqkv=jnp.zeros((L, 1, 3 * H), jnp.float32),
        wo=nrm(ko, (L, H, H)), bo=jnp.zeros((L, 1, H), jnp.float32),
        ln1_g=jnp.ones((L, 1, H), jnp.float32),
        ln1_b=jnp.zeros((L, 1, H), jnp.float32),
        w1=nrm(k1, (L, H, I)), b1=jnp.zeros((L, 1, I), jnp.float32),
        w2=nrm(k2, (L, I, H)), b2=jnp.zeros((L, 1, H), jnp.float32),
        ln2_g=jnp.ones((L, 1, H), jnp.float32),
        ln2_b=jnp.zeros((L, 1, H), jnp.float32),
    )
    return params


# TODO(synk): pretrained microsoft/codebert-base weights and tokenizer are not
# loaded; this is a shape-faithful, deterministically-initialized synthetic
# instantiation of the same forward pass.

if __name__ == "__main__":
    cfg = CONFIG
    key = jax.random.PRNGKey(0)
    k_param, k_ids = jax.random.split(key)

    params = init_params(k_param, cfg)

    B, S = cfg["batch"], cfg["seq_len"]
    input_ids = jax.random.randint(k_ids, (B, S), 2, cfg["vocab_size"],
                                   dtype=jnp.int32)
    # batch 0 fully attended; batch 1 has two padded positions at the end
    attention_mask = jnp.array(
        [[1] * S,
         [1] * (S - 2) + [0] * 2], dtype=jnp.int32)
    input_ids = jnp.where(attention_mask == 1, input_ids, cfg["pad_token_id"])

    fwd = jax.jit(functools.partial(codebert_classifier_forward, cfg=cfg))
    logits = fwd(params, input_ids, attention_mask)
    logits = jax.block_until_ready(logits)
    assert logits.shape == (B, cfg["num_labels"])
    assert bool(jnp.all(jnp.isfinite(logits)))
    print("KERNEL_OK")
</pallas_src>

<mosaic_0001>
module attributes {stable_mosaic.version = 11 : i64} {
  func.func @codebert_fused_kernel(%arg0: memref<16x32xf32, #tpu.memory_space<vmem>>, %arg1: memref<4x1x8xf32, #tpu.memory_space<vmem>>, %arg2: memref<1x32xf32, #tpu.memory_space<vmem>>, %arg3: memref<1x32xf32, #tpu.memory_space<vmem>>, %arg4: memref<2x32x96xf32, #tpu.memory_space<vmem>>, %arg5: memref<2x1x96xf32, #tpu.memory_space<vmem>>, %arg6: memref<2x32x32xf32, #tpu.memory_space<vmem>>, %arg7: memref<2x1x32xf32, #tpu.memory_space<vmem>>, %arg8: memref<2x1x32xf32, #tpu.memory_space<vmem>>, %arg9: memref<2x1x32xf32, #tpu.memory_space<vmem>>, %arg10: memref<2x32x64xf32, #tpu.memory_space<vmem>>, %arg11: memref<2x1x64xf32, #tpu.memory_space<vmem>>, %arg12: memref<2x64x32xf32, #tpu.memory_space<vmem>>, %arg13: memref<2x1x32xf32, #tpu.memory_space<vmem>>, %arg14: memref<2x1x32xf32, #tpu.memory_space<vmem>>, %arg15: memref<2x1x32xf32, #tpu.memory_space<vmem>>, %arg16: memref<32x32xf32, #tpu.memory_space<vmem>>, %arg17: memref<1x32xf32, #tpu.memory_space<vmem>>, %arg18: memref<32x4xf32, #tpu.memory_space<vmem>>, %arg19: memref<1x4xf32, #tpu.memory_space<vmem>>, %arg20: memref<2x4xf32, #tpu.memory_space<vmem>>) attributes {dimension_semantics = [], scalar_prefetch = 0 : i64, scratch_operands = 0 : i64, tpu.core_type = #tpu.core_type<tc>} {
    %c0 = arith.constant 0 : index
    %c0_0 = arith.constant 0 : index
    %c0_1 = arith.constant 0 : index
    %0 = vector.load %arg1[%c0, %c0_0, %c0_1] : memref<4x1x8xf32, #tpu.memory_space<vmem>>, vector<4x1x8xf32>
    %c0_2 = arith.constant 0 : index
    %c0_3 = arith.constant 0 : index
    %1 = vector.load %arg0[%c0_2, %c0_3] : memref<16x32xf32, #tpu.memory_space<vmem>>, vector<16x32xf32>
    %c0_4 = arith.constant 0 : index
    %c0_5 = arith.constant 0 : index
    %2 = vector.load %arg2[%c0_4, %c0_5] : memref<1x32xf32, #tpu.memory_space<vmem>>, vector<1x32xf32>
    %c0_6 = arith.constant 0 : index
    %c0_7 = arith.constant 0 : index
    %3 = vector.load %arg3[%c0_6, %c0_7] : memref<1x32xf32, #tpu.memory_space<vmem>>, vector<1x32xf32>
    %cst = arith.constant dense<0.000000e+00> : vector<16xf32>
    %4 = vector.multi_reduction <add>, %1, %cst [1] : vector<16x32xf32> to vector<16xf32>
    %5 = vector.shape_cast %4 : vector<16xf32> to vector<16x1xf32>
    %cst_8 = arith.constant 3.200000e+01 : f32
    %6 = vector.broadcast %cst_8 : f32 to vector<16x1xf32>
    %7 = arith.divf %5, %6 : vector<16x1xf32>
    %8 = vector.broadcast %7 : vector<16x1xf32> to vector<16x32xf32>
    %9 = arith.subf %1, %8 : vector<16x32xf32>
    %10 = arith.mulf %9, %9 : vector<16x32xf32>
    %cst_9 = arith.constant dense<0.000000e+00> : vector<16xf32>
    %11 = vector.multi_reduction <add>, %10, %cst_9 [1] : vector<16x32xf32> to vector<16xf32>
    %12 = vector.shape_cast %11 : vector<16xf32> to vector<16x1xf32>
    %cst_10 = arith.constant 3.200000e+01 : f32
    %13 = vector.broadcast %cst_10 : f32 to vector<16x1xf32>
    %14 = arith.divf %12, %13 : vector<16x1xf32>
    %15 = vector.broadcast %7 : vector<16x1xf32> to vector<16x32xf32>
    %16 = arith.subf %1, %15 : vector<16x32xf32>
    %cst_11 = arith.constant 9.99999974E-6 : f32
    %17 = vector.broadcast %cst_11 : f32 to vector<16x1xf32>
    %18 = arith.addf %14, %17 : vector<16x1xf32>
    %19 = math.rsqrt %18 : vector<16x1xf32>
    %20 = vector.broadcast %19 : vector<16x1xf32> to vector<16x32xf32>
    %21 = arith.mulf %16, %20 : vector<16x32xf32>
    %22 = vector.broadcast %2 : vector<1x32xf32> to vector<16x32xf32>
    %23 = arith.mulf %21, %22 : vector<16x32xf32>
    %24 = vector.broadcast %3 : vector<1x32xf32> to vector<16x32xf32>
    %25 = arith.addf %23, %24 : vector<16x32xf32>
    %c0_12 = arith.constant 0 : index
    %c0_13 = arith.constant 0 : index
    %c0_14 = arith.constant 0 : index
    %26 = vector.load %arg4[%c0_12, %c0_13, %c0_14] : memref<2x32x96xf32, #tpu.memory_space<vmem>>, vector<1x32x96xf32>
    %27 = vector.shape_cast %26 : vector<1x32x96xf32> to vector<32x96xf32>
    %cst_15 = arith.constant dense<0.000000e+00> : vector<16x96xf32>
    %28 = tpu.matmul %25, %27, %cst_15 {dimension_numbers = #tpu.dot_dimension_numbers<[1], [0], [0], [1], [0, 0, 1, 1], [], []>} : vector<16x32xf32>, vector<32x96xf32>, vector<16x96xf32> -> vector<16x96xf32>
    %c0_16 = arith.constant 0 : index
    %c0_17 = arith.constant 0 : index
    %c0_18 = arith.constant 0 : index
    %29 = vector.load %arg5[%c0_16, %c0_17, %c0_18] : memref<2x1x96xf32, #tpu.memory_space<vmem>>, vector<1x1x96xf32>
    %30 = vector.shape_cast %29 : vector<1x1x96xf32> to vector<1x96xf32>
    %31 = vector.broadcast %30 : vector<1x96xf32> to vector<16x96xf32>
    %32 = arith.addf %28, %31 : vector<16x96xf32>
    %33 = vector.extract_strided_slice %32 {offsets = [0, 0], sizes = [16, 32], strides = [1, 1]} : vector<16x96xf32> to vector<16x32xf32>
    %cst_19 = arith.constant 2.500000e-01 : f32
    %34 = vector.broadcast %cst_19 : f32 to vector<16x32xf32>
    %35 = arith.mulf %33, %34 : vector<16x32xf32>
    %36 = vector.shape_cast %35 : vector<16x32xf32> to vector<2x8x2x16xf32>
    %37 = tpu.transpose %36, [0, 2, 1, 3] : vector<2x8x2x16xf32> -> vector<2x2x8x16xf32>
    %38 = vector.shape_cast %37 : vector<2x2x8x16xf32> to vector<4x8x16xf32>
    %39 = vector.extract_strided_slice %32 {offsets = [0, 32], sizes = [16, 32], strides = [1, 1]} : vector<16x96xf32> to vector<16x32xf32>
    %40 = vector.shape_cast %39 : vector<16x32xf32> to vector<2x8x2x16xf32>
    %41 = tpu.transpose %40, [0, 2, 1, 3] : vector<2x8x2x16xf32> -> vector<2x2x8x16xf32>
    %42 = vector.shape_cast %41 : vector<2x2x8x16xf32> to vector<4x8x16xf32>
    %43 = vector.extract_strided_slice %32 {offsets = [0, 64], sizes = [16, 32], strides = [1, 1]} : vector<16x96xf32> to vector<16x32xf32>
    %44 = vector.shape_cast %43 : vector<16x32xf32> to vector<2x8x2x16xf32>
    %45 = tpu.transpose %44, [0, 2, 1, 3] : vector<2x8x2x16xf32> -> vector<2x2x8x16xf32>
    %46 = vector.shape_cast %45 : vector<2x2x8x16xf32> to vector<4x8x16xf32>
    "tpu.trace_start"() <{level = 10 : i32, message = "bqd,bkd->bqk"}> : () -> ()
    %cst_20 = arith.constant dense<0.000000e+00> : vector<4x8x8xf32>
    %47 = tpu.matmul %38, %42, %cst_20 {dimension_numbers = #tpu.dot_dimension_numbers<[2], [2], [1], [1], [0, 0, 0, 1, 1, 1], [0], [0]>} : vector<4x8x16xf32>, vector<4x8x16xf32>, vector<4x8x8xf32> -> vector<4x8x8xf32>
    "tpu.trace_stop"() : () -> ()
    %48 = vector.broadcast %0 : vector<4x1x8xf32> to vector<4x8x8xf32>
    %49 = arith.addf %47, %48 : vector<4x8x8xf32>
    %cst_21 = arith.constant dense<0xFF800000> : vector<4x8xf32>
    %50 = vector.multi_reduction <maximumf>, %49, %cst_21 [2] : vector<4x8x8xf32> to vector<4x8xf32>
    %51 = vector.shape_cast %50 : vector<4x8xf32> to vector<4x8x1xf32>
    %52 = vector.broadcast %51 : vector<4x8x1xf32> to vector<4x8x8xf32>
    %53 = arith.subf %49, %52 : vector<4x8x8xf32>
    %54 = math.exp %53 : vector<4x8x8xf32>
    %cst_22 = arith.constant dense<0.000000e+00> : vector<4x8xf32>
    %55 = vector.multi_reduction <add>, %54, %cst_22 [2] : vector<4x8x8xf32> to vector<4x8xf32>
    %56 = vector.shape_cast %55 : vector<4x8xf32> to vector<4x8x1xf32>
    %57 = tpu.reciprocal %56 {approx = true} : vector<4x8x1xf32> -> vector<4x8x1xf32>
    %58 = vector.broadcast %57 : vector<4x8x1xf32> to vector<4x8x8xf32>
    %59 = arith.mulf %54, %58 : vector<4x8x8xf32>
    "tpu.trace_start"() <{level = 10 : i32, message = "bqk,bkd->bqd"}> : () -> ()
    %cst_23 = arith.constant dense<0.000000e+00> : vector<4x8x16xf32>
    %60 = tpu.matmul %59, %46, %cst_23 {dimension_numbers = #tpu.dot_dimension_numbers<[2], [1], [1], [2], [0, 0, 0, 1, 1, 2], [0], [0]>} : vector<4x8x8xf32>, vector<4x8x16xf32>, vector<4x8x16xf32> -> vector<4x8x16xf32>
    "tpu.trace_stop"() : () -> ()
    %61 = vector.shape_cast %60 : vector<4x8x16xf32> to vector<2x2x8x16xf32>
    %62 = tpu.transpose %61, [0, 2, 1, 3] : vector<2x2x8x16xf32> -> vector<2x8x2x16xf32>
    %63 = vector.shape_cast %62 : vector<2x8x2x16xf32> to vector<16x32xf32>
    %c0_24 = arith.constant 0 : index
    %c0_25 = arith.constant 0 : index
    %c0_26 = arith.constant 0 : index
    %64 = vector.load %arg6[%c0_24, %c0_25, %c0_26] : memref<2x32x32xf32, #tpu.memory_space<vmem>>, vector<1x32x32xf32>
    %65 = vector.shape_cast %64 : vector<1x32x32xf32> to vector<32x32xf32>
    %cst_27 = arith.constant dense<0.000000e+00> : vector<16x32xf32>
    %66 = tpu.matmul %63, %65, %cst_27 {dimension_numbers = #tpu.dot_dimension_numbers<[1], [0], [0], [1], [0, 0, 1, 1], [], []>} : vector<16x32xf32>, vector<32x32xf32>, vector<16x32xf32> -> vector<16x32xf32>
    %c0_28 = arith.constant 0 : index
    %c0_29 = arith.constant 0 : index
    %c0_30 = arith.constant 0 : index
    %67 = vector.load %arg7[%c0_28, %c0_29, %c0_30] : memref<2x1x32xf32, #tpu.memory_space<vmem>>, vector<1x1x32xf32>
    %68 = vector.shape_cast %67 : vector<1x1x32xf32> to vector<1x32xf32>
    %69 = vector.broadcast %68 : vector<1x32xf32> to vector<16x32xf32>
    %70 = arith.addf %66, %69 : vector<16x32xf32>
    %71 = arith.addf %25, %70 : vector<16x32xf32>
    %c0_31 = arith.constant 0 : index
    %c0_32 = arith.constant 0 : index
    %c0_33 = arith.constant 0 : index
    %72 = vector.load %arg8[%c0_31, %c0_32, %c0_33] : memref<2x1x32xf32, #tpu.memory_space<vmem>>, vector<1x1x32xf32>
    %73 = vector.shape_cast %72 : vector<1x1x32xf32> to vector<1x32xf32>
    %c0_34 = arith.constant 0 : index
    %c0_35 = arith.constant 0 : index
    %c0_36 = arith.constant 0 : index
    %74 = vector.load %arg9[%c0_34, %c0_35, %c0_36] : memref<2x1x32xf32, #tpu.memory_space<vmem>>, vector<1x1x32xf32>
    %75 = vector.shape_cast %74 : vector<1x1x32xf32> to vector<1x32xf32>
    %cst_37 = arith.constant dense<0.000000e+00> : vector<16xf32>
    %76 = vector.multi_reduction <add>, %71, %cst_37 [1] : vector<16x32xf32> to vector<16xf32>
    %77 = vector.shape_cast %76 : vector<16xf32> to vector<16x1xf32>
    %cst_38 = arith.constant 3.200000e+01 : f32
    %78 = vector.broadcast %cst_38 : f32 to vector<16x1xf32>
    %79 = arith.divf %77, %78 : vector<16x1xf32>
    %80 = vector.broadcast %79 : vector<16x1xf32> to vector<16x32xf32>
    %81 = arith.subf %71, %80 : vector<16x32xf32>
    %82 = arith.mulf %81, %81 : vector<16x32xf32>
    %cst_39 = arith.constant dense<0.000000e+00> : vector<16xf32>
    %83 = vector.multi_reduction <add>, %82, %cst_39 [1] : vector<16x32xf32> to vector<16xf32>
    %84 = vector.shape_cast %83 : vector<16xf32> to vector<16x1xf32>
    %cst_40 = arith.constant 3.200000e+01 : f32
    %85 = vector.broadcast %cst_40 : f32 to vector<16x1xf32>
    %86 = arith.divf %84, %85 : vector<16x1xf32>
    %87 = vector.broadcast %79 : vector<16x1xf32> to vector<16x32xf32>
    %88 = arith.subf %71, %87 : vector<16x32xf32>
    %cst_41 = arith.constant 9.99999974E-6 : f32
    %89 = vector.broadcast %cst_41 : f32 to vector<16x1xf32>
    %90 = arith.addf %86, %89 : vector<16x1xf32>
    %91 = math.rsqrt %90 : vector<16x1xf32>
    %92 = vector.broadcast %91 : vector<16x1xf32> to vector<16x32xf32>
    %93 = arith.mulf %88, %92 : vector<16x32xf32>
    %94 = vector.broadcast %73 : vector<1x32xf32> to vector<16x32xf32>
    %95 = arith.mulf %93, %94 : vector<16x32xf32>
    %96 = vector.broadcast %75 : vector<1x32xf32> to vector<16x32xf32>
    %97 = arith.addf %95, %96 : vector<16x32xf32>
    %c0_42 = arith.constant 0 : index
    %c0_43 = arith.constant 0 : index
    %c0_44 = arith.constant 0 : index
    %98 = vector.load %arg10[%c0_42, %c0_43, %c0_44] : memref<2x32x64xf32, #tpu.memory_space<vmem>>, vector<1x32x64xf32>
    %99 = vector.shape_cast %98 : vector<1x32x64xf32> to vector<32x64xf32>
    %cst_45 = arith.constant dense<0.000000e+00> : vector<16x64xf32>
    %100 = tpu.matmul %97, %99, %cst_45 {dimension_numbers = #tpu.dot_dimension_numbers<[1], [0], [0], [1], [0, 0, 1, 1], [], []>} : vector<16x32xf32>, vector<32x64xf32>, vector<16x64xf32> -> vector<16x64xf32>
    %c0_46 = arith.constant 0 : index
    %c0_47 = arith.constant 0 : index
    %c0_48 = arith.constant 0 : index
    %101 = vector.load %arg11[%c0_46, %c0_47, %c0_48] : memref<2x1x64xf32, #tpu.memory_space<vmem>>, vector<1x1x64xf32>
    %102 = vector.shape_cast %101 : vector<1x1x64xf32> to vector<1x64xf32>
    %103 = vector.broadcast %102 : vector<1x64xf32> to vector<16x64xf32>
    %104 = arith.addf %100, %103 : vector<16x64xf32>
    %cst_49 = arith.constant 5.000000e-01 : f32
    %105 = vector.broadcast %cst_49 : f32 to vector<16x64xf32>
    %106 = arith.mulf %105, %104 : vector<16x64xf32>
    %cst_50 = arith.constant 0.707106769 : f32
    %107 = vector.broadcast %cst_50 : f32 to vector<16x64xf32>
    %108 = arith.mulf %104, %107 : vector<16x64xf32>
    %109 = math.erf %108 : vector<16x64xf32>
    %cst_51 = arith.constant 1.000000e+00 : f32
    %110 = vector.broadcast %cst_51 : f32 to vector<16x64xf32>
    %111 = arith.addf %110, %109 : vector<16x64xf32>
    %112 = arith.mulf %106, %111 : vector<16x64xf32>
    %c0_52 = arith.constant 0 : index
    %c0_53 = arith.constant 0 : index
    %c0_54 = arith.constant 0 : index
    %113 = vector.load %arg12[%c0_52, %c0_53, %c0_54] : memref<2x64x32xf32, #tpu.memory_space<vmem>>, vector<1x64x32xf32>
    %114 = vector.shape_cast %113 : vector<1x64x32xf32> to vector<64x32xf32>
    %cst_55 = arith.constant dense<0.000000e+00> : vector<16x32xf32>
    %115 = tpu.matmul %112, %114, %cst_55 {dimension_numbers = #tpu.dot_dimension_numbers<[1], [0], [0], [1], [0, 0, 1, 1], [], []>} : vector<16x64xf32>, vector<64x32xf32>, vector<16x32xf32> -> vector<16x32xf32>
    %c0_56 = arith.constant 0 : index
    %c0_57 = arith.constant 0 : index
    %c0_58 = arith.constant 0 : index
    %116 = vector.load %arg13[%c0_56, %c0_57, %c0_58] : memref<2x1x32xf32, #tpu.memory_space<vmem>>, vector<1x1x32xf32>
    %117 = vector.shape_cast %116 : vector<1x1x32xf32> to vector<1x32xf32>
    %118 = vector.broadcast %117 : vector<1x32xf32> to vector<16x32xf32>
    %119 = arith.addf %115, %118 : vector<16x32xf32>
    %120 = arith.addf %97, %119 : vector<16x32xf32>
    %c0_59 = arith.constant 0 : index
    %c0_60 = arith.constant 0 : index
    %c0_61 = arith.constant 0 : index
    %121 = vector.load %arg14[%c0_59, %c0_60, %c0_61] : memref<2x1x32xf32, #tpu.memory_space<vmem>>, vector<1x1x32xf32>
    %122 = vector.shape_cast %121 : vector<1x1x32xf32> to vector<1x32xf32>
    %c0_62 = arith.constant 0 : index
    %c0_63 = arith.constant 0 : index
    %c0_64 = arith.constant 0 : index
    %123 = vector.load %arg15[%c0_62, %c0_63, %c0_64] : memref<2x1x32xf32, #tpu.memory_space<vmem>>, vector<1x1x32xf32>
    %124 = vector.shape_cast %123 : vector<1x1x32xf32> to vector<1x32xf32>
    %cst_65 = arith.constant dense<0.000000e+00> : vector<16xf32>
    %125 = vector.multi_reduction <add>, %120, %cst_65 [1] : vector<16x32xf32> to vector<16xf32>
    %126 = vector.shape_cast %125 : vector<16xf32> to vector<16x1xf32>
    %cst_66 = arith.constant 3.200000e+01 : f32
    %127 = vector.broadcast %cst_66 : f32 to vector<16x1xf32>
    %128 = arith.divf %126, %127 : vector<16x1xf32>
    %129 = vector.broadcast %128 : vector<16x1xf32> to vector<16x32xf32>
    %130 = arith.subf %120, %129 : vector<16x32xf32>
    %131 = arith.mulf %130, %130 : vector<16x32xf32>
    %cst_67 = arith.constant dense<0.000000e+00> : vector<16xf32>
    %132 = vector.multi_reduction <add>, %131, %cst_67 [1] : vector<16x32xf32> to vector<16xf32>
    %133 = vector.shape_cast %132 : vector<16xf32> to vector<16x1xf32>
    %cst_68 = arith.constant 3.200000e+01 : f32
    %134 = vector.broadcast %cst_68 : f32 to vector<16x1xf32>
    %135 = arith.divf %133, %134 : vector<16x1xf32>
    %136 = vector.broadcast %128 : vector<16x1xf32> to vector<16x32xf32>
    %137 = arith.subf %120, %136 : vector<16x32xf32>
    %cst_69 = arith.constant 9.99999974E-6 : f32
    %138 = vector.broadcast %cst_69 : f32 to vector<16x1xf32>
    %139 = arith.addf %135, %138 : vector<16x1xf32>
    %140 = math.rsqrt %139 : vector<16x1xf32>
    %141 = vector.broadcast %140 : vector<16x1xf32> to vector<16x32xf32>
    %142 = arith.mulf %137, %141 : vector<16x32xf32>
    %143 = vector.broadcast %122 : vector<1x32xf32> to vector<16x32xf32>
    %144 = arith.mulf %142, %143 : vector<16x32xf32>
    %145 = vector.broadcast %124 : vector<1x32xf32> to vector<16x32xf32>
    %146 = arith.addf %144, %145 : vector<16x32xf32>
    %c1 = arith.constant 1 : index
    %c0_70 = arith.constant 0 : index
    %c0_71 = arith.constant 0 : index
    %147 = vector.load %arg4[%c1, %c0_70, %c0_71] : memref<2x32x96xf32, #tpu.memory_space<vmem>>, vector<1x32x96xf32>
    %148 = vector.shape_cast %147 : vector<1x32x96xf32> to vector<32x96xf32>
    %cst_72 = arith.constant dense<0.000000e+00> : vector<16x96xf32>
    %149 = tpu.matmul %146, %148, %cst_72 {dimension_numbers = #tpu.dot_dimension_numbers<[1], [0], [0], [1], [0, 0, 1, 1], [], []>} : vector<16x32xf32>, vector<32x96xf32>, vector<16x96xf32> -> vector<16x96xf32>
    %c1_73 = arith.constant 1 : index
    %c0_74 = arith.constant 0 : index
    %c0_75 = arith.constant 0 : index
    %150 = vector.load %arg5[%c1_73, %c0_74, %c0_75] : memref<2x1x96xf32, #tpu.memory_space<vmem>>, vector<1x1x96xf32>
    %151 = vector.shape_cast %150 : vector<1x1x96xf32> to vector<1x96xf32>
    %152 = vector.broadcast %151 : vector<1x96xf32> to vector<16x96xf32>
    %153 = arith.addf %149, %152 : vector<16x96xf32>
    %154 = vector.extract_strided_slice %153 {offsets = [0, 0], sizes = [16, 32], strides = [1, 1]} : vector<16x96xf32> to vector<16x32xf32>
    %cst_76 = arith.constant 2.500000e-01 : f32
    %155 = vector.broadcast %cst_76 : f32 to vector<16x32xf32>
    %156 = arith.mulf %154, %155 : vector<16x32xf32>
    %157 = vector.shape_cast %156 : vector<16x32xf32> to vector<2x8x2x16xf32>
    %158 = tpu.transpose %157, [0, 2, 1, 3] : vector<2x8x2x16xf32> -> vector<2x2x8x16xf32>
    %159 = vector.shape_cast %158 : vector<2x2x8x16xf32> to vector<4x8x16xf32>
    %160 = vector.extract_strided_slice %153 {offsets = [0, 32], sizes = [16, 32], strides = [1, 1]} : vector<16x96xf32> to vector<16x32xf32>
    %161 = vector.shape_cast %160 : vector<16x32xf32> to vector<2x8x2x16xf32>
    %162 = tpu.transpose %161, [0, 2, 1, 3] : vector<2x8x2x16xf32> -> vector<2x2x8x16xf32>
    %163 = vector.shape_cast %162 : vector<2x2x8x16xf32> to vector<4x8x16xf32>
    %164 = vector.extract_strided_slice %153 {offsets = [0, 64], sizes = [16, 32], strides = [1, 1]} : vector<16x96xf32> to vector<16x32xf32>
    %165 = vector.shape_cast %164 : vector<16x32xf32> to vector<2x8x2x16xf32>
    %166 = tpu.transpose %165, [0, 2, 1, 3] : vector<2x8x2x16xf32> -> vector<2x2x8x16xf32>
    %167 = vector.shape_cast %166 : vector<2x2x8x16xf32> to vector<4x8x16xf32>
    "tpu.trace_start"() <{level = 10 : i32, message = "bqd,bkd->bqk"}> : () -> ()
    %cst_77 = arith.constant dense<0.000000e+00> : vector<4x8x8xf32>
    %168 = tpu.matmul %159, %163, %cst_77 {dimension_numbers = #tpu.dot_dimension_numbers<[2], [2], [1], [1], [0, 0, 0, 1, 1, 1], [0], [0]>} : vector<4x8x16xf32>, vector<4x8x16xf32>, vector<4x8x8xf32> -> vector<4x8x8xf32>
    "tpu.trace_stop"() : () -> ()
    %169 = vector.broadcast %0 : vector<4x1x8xf32> to vector<4x8x8xf32>
    %170 = arith.addf %168, %169 : vector<4x8x8xf32>
    %cst_78 = arith.constant dense<0xFF800000> : vector<4x8xf32>
    %171 = vector.multi_reduction <maximumf>, %170, %cst_78 [2] : vector<4x8x8xf32> to vector<4x8xf32>
    %172 = vector.shape_cast %171 : vector<4x8xf32> to vector<4x8x1xf32>
    %173 = vector.broadcast %172 : vector<4x8x1xf32> to vector<4x8x8xf32>
    %174 = arith.subf %170, %173 : vector<4x8x8xf32>
    %175 = math.exp %174 : vector<4x8x8xf32>
    %cst_79 = arith.constant dense<0.000000e+00> : vector<4x8xf32>
    %176 = vector.multi_reduction <add>, %175, %cst_79 [2] : vector<4x8x8xf32> to vector<4x8xf32>
    %177 = vector.shape_cast %176 : vector<4x8xf32> to vector<4x8x1xf32>
    %178 = tpu.reciprocal %177 {approx = true} : vector<4x8x1xf32> -> vector<4x8x1xf32>
    %179 = vector.broadcast %178 : vector<4x8x1xf32> to vector<4x8x8xf32>
    %180 = arith.mulf %175, %179 : vector<4x8x8xf32>
    "tpu.trace_start"() <{level = 10 : i32, message = "bqk,bkd->bqd"}> : () -> ()
    %cst_80 = arith.constant dense<0.000000e+00> : vector<4x8x16xf32>
    %181 = tpu.matmul %180, %167, %cst_80 {dimension_numbers = #tpu.dot_dimension_numbers<[2], [1], [1], [2], [0, 0, 0, 1, 1, 2], [0], [0]>} : vector<4x8x8xf32>, vector<4x8x16xf32>, vector<4x8x16xf32> -> vector<4x8x16xf32>
    "tpu.trace_stop"() : () -> ()
    %182 = vector.shape_cast %181 : vector<4x8x16xf32> to vector<2x2x8x16xf32>
    %183 = tpu.transpose %182, [0, 2, 1, 3] : vector<2x2x8x16xf32> -> vector<2x8x2x16xf32>
    %184 = vector.shape_cast %183 : vector<2x8x2x16xf32> to vector<16x32xf32>
    %c1_81 = arith.constant 1 : index
    %c0_82 = arith.constant 0 : index
    %c0_83 = arith.constant 0 : index
    %185 = vector.load %arg6[%c1_81, %c0_82, %c0_83] : memref<2x32x32xf32, #tpu.memory_space<vmem>>, vector<1x32x32xf32>
    %186 = vector.shape_cast %185 : vector<1x32x32xf32> to vector<32x32xf32>
    %cst_84 = arith.constant dense<0.000000e+00> : vector<16x32xf32>
    %187 = tpu.matmul %184, %186, %cst_84 {dimension_numbers = #tpu.dot_dimension_numbers<[1], [0], [0], [1], [0, 0, 1, 1], [], []>} : vector<16x32xf32>, vector<32x32xf32>, vector<16x32xf32> -> vector<16x32xf32>
    %c1_85 = arith.constant 1 : index
    %c0_86 = arith.constant 0 : index
    %c0_87 = arith.constant 0 : index
    %188 = vector.load %arg7[%c1_85, %c0_86, %c0_87] : memref<2x1x32xf32, #tpu.memory_space<vmem>>, vector<1x1x32xf32>
    %189 = vector.shape_cast %188 : vector<1x1x32xf32> to vector<1x32xf32>
    %190 = vector.broadcast %189 : vector<1x32xf32> to vector<16x32xf32>
    %191 = arith.addf %187, %190 : vector<16x32xf32>
    %192 = arith.addf %146, %191 : vector<16x32xf32>
    %c1_88 = arith.constant 1 : index
    %c0_89 = arith.constant 0 : index
    %c0_90 = arith.constant 0 : index
    %193 = vector.load %arg8[%c1_88, %c0_89, %c0_90] : memref<2x1x32xf32, #tpu.memory_space<vmem>>, vector<1x1x32xf32>
    %194 = vector.shape_cast %193 : vector<1x1x32xf32> to vector<1x32xf32>
    %c1_91 = arith.constant 1 : index
    %c0_92 = arith.constant 0 : index
    %c0_93 = arith.constant 0 : index
    %195 = vector.load %arg9[%c1_91, %c0_92, %c0_93] : memref<2x1x32xf32, #tpu.memory_space<vmem>>, vector<1x1x32xf32>
    %196 = vector.shape_cast %195 : vector<1x1x32xf32> to vector<1x32xf32>
    %cst_94 = arith.constant dense<0.000000e+00> : vector<16xf32>
    %197 = vector.multi_reduction <add>, %192, %cst_94 [1] : vector<16x32xf32> to vector<16xf32>
    %198 = vector.shape_cast %197 : vector<16xf32> to vector<16x1xf32>
    %cst_95 = arith.constant 3.200000e+01 : f32
    %199 = vector.broadcast %cst_95 : f32 to vector<16x1xf32>
    %200 = arith.divf %198, %199 : vector<16x1xf32>
    %201 = vector.broadcast %200 : vector<16x1xf32> to vector<16x32xf32>
    %202 = arith.subf %192, %201 : vector<16x32xf32>
    %203 = arith.mulf %202, %202 : vector<16x32xf32>
    %cst_96 = arith.constant dense<0.000000e+00> : vector<16xf32>
    %204 = vector.multi_reduction <add>, %203, %cst_96 [1] : vector<16x32xf32> to vector<16xf32>
    %205 = vector.shape_cast %204 : vector<16xf32> to vector<16x1xf32>
    %cst_97 = arith.constant 3.200000e+01 : f32
    %206 = vector.broadcast %cst_97 : f32 to vector<16x1xf32>
    %207 = arith.divf %205, %206 : vector<16x1xf32>
    %208 = vector.broadcast %200 : vector<16x1xf32> to vector<16x32xf32>
    %209 = arith.subf %192, %208 : vector<16x32xf32>
    %cst_98 = arith.constant 9.99999974E-6 : f32
    %210 = vector.broadcast %cst_98 : f32 to vector<16x1xf32>
    %211 = arith.addf %207, %210 : vector<16x1xf32>
    %212 = math.rsqrt %211 : vector<16x1xf32>
    %213 = vector.broadcast %212 : vector<16x1xf32> to vector<16x32xf32>
    %214 = arith.mulf %209, %213 : vector<16x32xf32>
    %215 = vector.broadcast %194 : vector<1x32xf32> to vector<16x32xf32>
    %216 = arith.mulf %214, %215 : vector<16x32xf32>
    %217 = vector.broadcast %196 : vector<1x32xf32> to vector<16x32xf32>
    %218 = arith.addf %216, %217 : vector<16x32xf32>
    %c1_99 = arith.constant 1 : index
    %c0_100 = arith.constant 0 : index
    %c0_101 = arith.constant 0 : index
    %219 = vector.load %arg10[%c1_99, %c0_100, %c0_101] : memref<2x32x64xf32, #tpu.memory_space<vmem>>, vector<1x32x64xf32>
    %220 = vector.shape_cast %219 : vector<1x32x64xf32> to vector<32x64xf32>
    %cst_102 = arith.constant dense<0.000000e+00> : vector<16x64xf32>
    %221 = tpu.matmul %218, %220, %cst_102 {dimension_numbers = #tpu.dot_dimension_numbers<[1], [0], [0], [1], [0, 0, 1, 1], [], []>} : vector<16x32xf32>, vector<32x64xf32>, vector<16x64xf32> -> vector<16x64xf32>
    %c1_103 = arith.constant 1 : index
    %c0_104 = arith.constant 0 : index
    %c0_105 = arith.constant 0 : index
    %222 = vector.load %arg11[%c1_103, %c0_104, %c0_105] : memref<2x1x64xf32, #tpu.memory_space<vmem>>, vector<1x1x64xf32>
    %223 = vector.shape_cast %222 : vector<1x1x64xf32> to vector<1x64xf32>
    %224 = vector.broadcast %223 : vector<1x64xf32> to vector<16x64xf32>
    %225 = arith.addf %221, %224 : vector<16x64xf32>
    %cst_106 = arith.constant 5.000000e-01 : f32
    %226 = vector.broadcast %cst_106 : f32 to vector<16x64xf32>
    %227 = arith.mulf %226, %225 : vector<16x64xf32>
    %cst_107 = arith.constant 0.707106769 : f32
    %228 = vector.broadcast %cst_107 : f32 to vector<16x64xf32>
    %229 = arith.mulf %225, %228 : vector<16x64xf32>
    %230 = math.erf %229 : vector<16x64xf32>
    %cst_108 = arith.constant 1.000000e+00 : f32
    %231 = vector.broadcast %cst_108 : f32 to vector<16x64xf32>
    %232 = arith.addf %231, %230 : vector<16x64xf32>
    %233 = arith.mulf %227, %232 : vector<16x64xf32>
    %c1_109 = arith.constant 1 : index
    %c0_110 = arith.constant 0 : index
    %c0_111 = arith.constant 0 : index
    %234 = vector.load %arg12[%c1_109, %c0_110, %c0_111] : memref<2x64x32xf32, #tpu.memory_space<vmem>>, vector<1x64x32xf32>
    %235 = vector.shape_cast %234 : vector<1x64x32xf32> to vector<64x32xf32>
    %cst_112 = arith.constant dense<0.000000e+00> : vector<16x32xf32>
    %236 = tpu.matmul %233, %235, %cst_112 {dimension_numbers = #tpu.dot_dimension_numbers<[1], [0], [0], [1], [0, 0, 1, 1], [], []>} : vector<16x64xf32>, vector<64x32xf32>, vector<16x32xf32> -> vector<16x32xf32>
    %c1_113 = arith.constant 1 : index
    %c0_114 = arith.constant 0 : index
    %c0_115 = arith.constant 0 : index
    %237 = vector.load %arg13[%c1_113, %c0_114, %c0_115] : memref<2x1x32xf32, #tpu.memory_space<vmem>>, vector<1x1x32xf32>
    %238 = vector.shape_cast %237 : vector<1x1x32xf32> to vector<1x32xf32>
    %239 = vector.broadcast %238 : vector<1x32xf32> to vector<16x32xf32>
    %240 = arith.addf %236, %239 : vector<16x32xf32>
    %241 = arith.addf %218, %240 : vector<16x32xf32>
    %c1_116 = arith.constant 1 : index
    %c0_117 = arith.constant 0 : index
    %c0_118 = arith.constant 0 : index
    %242 = vector.load %arg14[%c1_116, %c0_117, %c0_118] : memref<2x1x32xf32, #tpu.memory_space<vmem>>, vector<1x1x32xf32>
    %243 = vector.shape_cast %242 : vector<1x1x32xf32> to vector<1x32xf32>
    %c1_119 = arith.constant 1 : index
    %c0_120 = arith.constant 0 : index
    %c0_121 = arith.constant 0 : index
    %244 = vector.load %arg15[%c1_119, %c0_120, %c0_121] : memref<2x1x32xf32, #tpu.memory_space<vmem>>, vector<1x1x32xf32>
    %245 = vector.shape_cast %244 : vector<1x1x32xf32> to vector<1x32xf32>
    %cst_122 = arith.constant dense<0.000000e+00> : vector<16xf32>
    %246 = vector.multi_reduction <add>, %241, %cst_122 [1] : vector<16x32xf32> to vector<16xf32>
    %247 = vector.shape_cast %246 : vector<16xf32> to vector<16x1xf32>
    %cst_123 = arith.constant 3.200000e+01 : f32
    %248 = vector.broadcast %cst_123 : f32 to vector<16x1xf32>
    %249 = arith.divf %247, %248 : vector<16x1xf32>
    %250 = vector.broadcast %249 : vector<16x1xf32> to vector<16x32xf32>
    %251 = arith.subf %241, %250 : vector<16x32xf32>
    %252 = arith.mulf %251, %251 : vector<16x32xf32>
    %cst_124 = arith.constant dense<0.000000e+00> : vector<16xf32>
    %253 = vector.multi_reduction <add>, %252, %cst_124 [1] : vector<16x32xf32> to vector<16xf32>
    %254 = vector.shape_cast %253 : vector<16xf32> to vector<16x1xf32>
    %cst_125 = arith.constant 3.200000e+01 : f32
    %255 = vector.broadcast %cst_125 : f32 to vector<16x1xf32>
    %256 = arith.divf %254, %255 : vector<16x1xf32>
    %257 = vector.broadcast %249 : vector<16x1xf32> to vector<16x32xf32>
    %258 = arith.subf %241, %257 : vector<16x32xf32>
    %cst_126 = arith.constant 9.99999974E-6 : f32
    %259 = vector.broadcast %cst_126 : f32 to vector<16x1xf32>
    %260 = arith.addf %256, %259 : vector<16x1xf32>
    %261 = math.rsqrt %260 : vector<16x1xf32>
    %262 = vector.broadcast %261 : vector<16x1xf32> to vector<16x32xf32>
    %263 = arith.mulf %258, %262 : vector<16x32xf32>
    %264 = vector.broadcast %243 : vector<1x32xf32> to vector<16x32xf32>
    %265 = arith.mulf %263, %264 : vector<16x32xf32>
    %266 = vector.broadcast %245 : vector<1x32xf32> to vector<16x32xf32>
    %267 = arith.addf %265, %266 : vector<16x32xf32>
    %268 = vector.shape_cast %267 : vector<16x32xf32> to vector<2x8x32xf32>
    %269 = vector.extract_strided_slice %268 {offsets = [0, 0, 0], sizes = [2, 1, 32], strides = [1, 1, 1]} : vector<2x8x32xf32> to vector<2x1x32xf32>
    %270 = vector.shape_cast %269 : vector<2x1x32xf32> to vector<2x32xf32>
    %c0_127 = arith.constant 0 : index
    %c0_128 = arith.constant 0 : index
    %271 = vector.load %arg16[%c0_127, %c0_128] : memref<32x32xf32, #tpu.memory_space<vmem>>, vector<32x32xf32>
    %cst_129 = arith.constant dense<0.000000e+00> : vector<2x32xf32>
    %272 = tpu.matmul %270, %271, %cst_129 {dimension_numbers = #tpu.dot_dimension_numbers<[1], [0], [0], [1], [0, 0, 1, 1], [], []>} : vector<2x32xf32>, vector<32x32xf32>, vector<2x32xf32> -> vector<2x32xf32>
    %c0_130 = arith.constant 0 : index
    %c0_131 = arith.constant 0 : index
    %273 = vector.load %arg17[%c0_130, %c0_131] : memref<1x32xf32, #tpu.memory_space<vmem>>, vector<1x32xf32>
    %274 = vector.broadcast %273 : vector<1x32xf32> to vector<2x32xf32>
    %275 = arith.addf %272, %274 : vector<2x32xf32>
    %276 = math.tanh %275 : vector<2x32xf32>
    %c0_132 = arith.constant 0 : index
    %c0_133 = arith.constant 0 : index
    %277 = vector.load %arg18[%c0_132, %c0_133] : memref<32x4xf32, #tpu.memory_space<vmem>>, vector<32x4xf32>
    %cst_134 = arith.constant dense<0.000000e+00> : vector<2x4xf32>
    %278 = tpu.matmul %276, %277, %cst_134 {dimension_numbers = #tpu.dot_dimension_numbers<[1], [0], [0], [1], [0, 0, 1, 1], [], []>} : vector<2x32xf32>, vector<32x4xf32>, vector<2x4xf32> -> vector<2x4xf32>
    %c0_135 = arith.constant 0 : index
    %c0_136 = arith.constant 0 : index
    %279 = vector.load %arg19[%c0_135, %c0_136] : memref<1x4xf32, #tpu.memory_space<vmem>>, vector<1x4xf32>
    %280 = vector.broadcast %279 : vector<1x4xf32> to vector<2x4xf32>
    %281 = arith.addf %278, %280 : vector<2x4xf32>
    %c0_137 = arith.constant 0 : index
    %c0_138 = arith.constant 0 : index
    %282 = vector.load %arg20[%c0_137, %c0_138] : memref<2x4xf32, #tpu.memory_space<vmem>>, vector<2x4xf32>
    tpu.vector_store %arg20[%c0_137, %c0_138], %281 {strides = array<i32>} : memref<2x4xf32, #tpu.memory_space<vmem>>, vector<2x4xf32>,
    return
  }
}

</mosaic_0001>

<bundles_post_ra>
// kernel: codebert_classifier_forward.1
= control target key start
LH: loop header
LB: loop body
LE: loop exit
PB: predicated region body
PF: predicated region fallthrough
CT: control target
= control target key end

     0   :  { %s5948_s0 = inlined_call_operand.vmem [shape: f32[16,32], index: 0, kind: input, shape index: {}]   ;;  %s5949_s1 = inlined_call_operand.vmem [shape: f32[4,1,8], index: 1, kind: input, shape index: {}]   ;;  %s5950_s2 = inlined_call_operand.vmem [shape: f32[1,32], index: 2, kind: input, shape index: {}]   ;;  %s5951_s3 = inlined_call_operand.vmem [shape: f32[1,32], index: 3, kind: input, shape index: {}]   ;;  %s5952_s4 = inlined_call_operand.vmem [shape: f32[2,32,96], index: 4, kind: input, shape index: {}]   ;;  %s5953_s5 = inlined_call_operand.vmem [shape: f32[2,1,96], index: 5, kind: input, shape index: {}]   ;;  %s5954_s6 = inlined_call_operand.vmem [shape: f32[2,32,32], index: 6, kind: input, shape index: {}]   ;;  %s5955_s7 = inlined_call_operand.vmem [shape: f32[2,1,32], index: 7, kind: input, shape index: {}]   ;;  %s5956_s8 = inlined_call_operand.vmem [shape: f32[2,1,32], index: 8, kind: input, shape index: {}]   ;;  %s5957_s9 = inlined_call_operand.vmem [shape: f32[2,1,32], index: 9, kind: input, shape index: {}]   ;;  %s5958_s10 = inlined_call_operand.vmem [shape: f32[2,32,64], index: 10, kind: input, shape index: {}]   ;;  %s5959_s11 = inlined_call_operand.vmem [shape: f32[2,1,64], index: 11, kind: input, shape index: {}]   ;;  %s5960_s12 = inlined_call_operand.vmem [shape: f32[2,64,32], index: 12, kind: input, shape index: {}]   ;;  %s5961_s13 = inlined_call_operand.vmem [shape: f32[2,1,32], index: 13, kind: input, shape index: {}]   ;;  %s5962_s14 = inlined_call_operand.vmem [shape: f32[2,1,32], index: 14, kind: input, shape index: {}]   ;;  %s5963_s15 = inlined_call_operand.vmem [shape: f32[2,1,32], index: 15, kind: input, shape index: {}]   ;;  %s5964_s16 = inlined_call_operand.vmem [shape: f32[32,32], index: 16, kind: input, shape index: {}]   ;;  %s5965_s17 = inlined_call_operand.vmem [shape: f32[1,32], index: 17, kind: input, shape index: {}]   ;;  %s5966_s18 = inlined_call_operand.vmem [shape: f32[32,4], index: 18, kind: input, shape index: {}]   ;;  %s5967_s19 = inlined_call_operand.vmem [shape: f32[1,4], index: 19, kind: input, shape index: {}]   ;;  %s5968_s20 = inlined_call_operand.hbm [shape: f32[2,4], index: 20, kind: output, shape index: {}]  }
   0x1   :  { %5972 = sst [smem:[#allocation5_spill]] %s5948_s0 }
   0x2   :  { %5973 = sst [smem:[#allocation6_spill]] %s5949_s1 }
   0x3   :  { %5974 = sst [smem:[#allocation7_spill]] %s5950_s2 }
   0x4   :  { %5975 = sst [smem:[#allocation8_spill]] %s5951_s3 }
   0x5   :  { %5976 = sst [smem:[#allocation9_spill]] %s5952_s4 }
   0x6   :  { %s5977_s23 = sld [smem:[#allocation5_spill]]  ;;  %vm74_vm0 = vcmask 261120  }
   0xc   :  { %v70_v0 = vld [vmem:[%s5977_s23] sm:$0xff]  ;;  %v71_v1 = vld [vmem:[%s5977_s23 + $0x8] sm:$0xff] }
   0xd   :  { %25 = vsyncpa [#allocation3], 0  ;;  %v75_v2 = vsel %vm74_vm0, %v70_v0, 0.0  ;;  %v78_v3 = vsel %vm74_vm0, %v71_v1, 0.0  ;;  %s5978_s26 = sld [smem:[#allocation9_spill]]  ;;  %v5057_v34 = vmov 0.0   ;;  %v224_v46 = vlaneseq }
   0xe   :  { %76 = vadd.xlane.f32.xlu0 %v75_v2  ;;  %s5979_s22 = sld [smem:[#allocation7_spill]]  ;;  %4765 = vmatprep.subr.mxu1 %v5057_v34  ;;  %v4532_v35 = vld [vmem:[%s5953_s5] ss:$0 sm:$0xff]  ;;  %s5058_s27 = smov 112   ;;  %vm5060_vm1 = vmmov 0   ;;  %vm970_vm2 = vcmask 130048  }
   0xf   :  { %s5980_s2 = sld [smem:[#allocation8_spill]]  ;;  %s5059_s28 = smov 96   ;;  %4767 = vmatprep.mubr.msk.f32.mxu1 %vm5060_vm1, %v5057_v34  ;;  %v5061_v44 = vmov 1983009808   ;;  %v225_v49 = vshrl.u32 %v224_v46, 7  ;;  %vm1275_vm3 = vcmask 64512  }
  0x10   :  { %v222_v45 = vunpack.c.l.s4 %v5061_v44  ;;  %v5062_v50 = vmov 1934713408   ;;  %s5981_s30 = sld [smem:[#allocation6_spill]]  ;;  %s5064_s23 = smov 16   ;;  %vm2109_vm4 = vcmask 523264   ;;  %vm4355_vm5 = vcmask 1041409  }
  0x11   :  { %v253_v51 = vunpack.c.l.s4 %v5062_v50  ;;  %vm4514_vm6 = vcmask 25600  }
  0x12   :  { %79 = vadd.xlane.f32.xlu0 %v78_v3  ;;  %v223_v48 = vunpack.c.0.s8 %v222_v45 }
  0x13   :  { %v121_v14 = vld [vmem:[%s5978_s26 + $0x18] sm:$0xff]  ;;  %v120_v15 = vld [vmem:[%s5978_s26 + $0x10] sm:$0xff]  ;;  %v119_v16 = vld [vmem:[%s5978_s26 + $0x8] sm:$0xff]  ;;  %v254_v55 = vunpack.c.0.s8 %v253_v51 }
  0x14   :  { %4754 = vmatprep.subr.mxu0 %v121_v14  ;;  %v118_v17 = vld [vmem:[%s5978_s26] sm:$0xff]  ;;  %v5242_v54 = vsub.s32 %v223_v48, %v225_v49 }
  0x15   :  { %4755 = vmatpush3.msra.mxu0 %v121_v14  ;;  %v4530_v25 = vld [vmem:[%s5979_s22] ss:$0 sm:$0xff]  ;;  %v5248_v60 = vsub.s32 %v254_v55, %v225_v49 }
  0x16   :  { %4756 = vmatprep.subr.mxu0 %v120_v15  ;;  %v4531_v27 = vld [vmem:[%s5980_s2] ss:$0 sm:$0xff]  ;;  %s5063_s2 = smov 64  }
  0x17   :  { %4757 = vmatpush3.msra.mxu0 %v120_v15 }
  0x18   :  { %4758 = vmatprep.subr.mxu0 %v119_v16 }
  0x19   :  { %4759 = vmatpush3.msra.mxu0 %v119_v16 }
  0x1a   :  { %4760 = vmatprep.subr.mxu0 %v118_v17 }
  0x1b   :  { %4761 = vmatpush3.msra.mxu0 %v118_v17 }
  0x1c   :  { %4775 = vmatprep.subr.mxu0 %v5057_v34 }
  0x97   :  { %v77_v4 = vpop.xlane.xlu0 %76 }
  0x98   :  { %v82_v5 = vmul.f32 0.03125, %v77_v4 }
  0x9a   :  { %v84_v6 = vsub.f32 %v70_v0, %v82_v5 }
  0x9b   :  { %v80_v7 = vpop.xlane.xlu0 %79 }
  0x9c   :  { %v83_v8 = vmul.f32 0.03125, %v80_v7  ;;  %v86_v9 = vmul.f32 %v84_v6, %v84_v6 }
  0x9e   :  { %v85_v10 = vsub.f32 %v71_v1, %v83_v8  ;;  %v88_v11 = vsel %vm74_vm0, %v86_v9, 0.0 }
  0x9f   :  { %89 = vadd.xlane.f32.xlu1 %v88_v11 }
  0xa0   :  { %v87_v12 = vmul.f32 %v85_v10, %v85_v10 }
  0xa2   :  { %v91_v13 = vsel %vm74_vm0, %v87_v12, 0.0 }
  0xa3   :  { %92 = vadd.xlane.f32.xlu1 %v91_v13 }
 0x128   :  { %v90_v18 = vpop.xlane.xlu1 %89 }
 0x129   :  { %v94_v19 = vmul.f32 0.03125, %v90_v18 }
 0x12b   :  { %v96_v20 = vadd.f32 1e-05, %v94_v19 }
 0x12c   :  { %v93_v21 = vpop.xlane.xlu1 %92 }
 0x12d   :  { %4969 = vrsqrt.f32 %v96_v20  ;;  %v95_v22 = vmul.f32 0.03125, %v93_v21 }
 0x12f   :  { %v97_v23 = vadd.f32 1e-05, %v95_v22 }
 0x131   :  { %4971 = vrsqrt.f32 %v97_v23 }
 0x13a   :  { %v4970_v24 = vpop.eup %4969 }
 0x13b   :  { %v100_v26 = vmul.f32 %v4970_v24, %v84_v6 }
 0x13d   :  { %v108_v28 = vmul.f32 %v4530_v25, %v100_v26 }
 0x13e   :  { %v4972_v29 = vpop.eup %4971 }
 0x13f   :  { %v101_v30 = vmul.f32 %v4972_v29, %v85_v10  ;;  %v5199_v31 = vadd.f32 %v4531_v27, %v108_v28 }
 0x141   :  { %v109_v32 = vmul.f32 %v4530_v25, %v101_v30  ;;  %4762 = vmatprep.mubr.msk.f32.mxu0 %vm74_vm0, %v5199_v31 }
 0x143   :  { %v5203_v33 = vadd.f32 %v4531_v27, %v109_v32 }
 0x145   :  { %4763 = vmatmul.mubr.msk.f32.vlgmr.msra.gmra.mxu0 %vm74_vm0, %v5203_v33 }
 0x146   :  { %4777 = vmatprep.mubr.msk.f32.mxu0 %vm5060_vm1, %v5057_v34 }
 0x205   :  { %v4764_v36 = vpop.f32.mrf.mxu0 }
 0x206   :  { %v5212_v37 = vadd.f32 %v4764_v36, %v4532_v35 }
 0x207   :  { %v201_v38 = vpop.f32.mrf.mxu0 }
 0x208   :  { %v5214_v39 = vadd.f32 %v4532_v35, %v201_v38  ;;  %456 = vrot.lane.b32.xlu1 %v5212_v37, %s5058_s27  ;;  %v211_v43 = vmul.f32 0.25, %v5212_v37 }
 0x20a   :  { %454 = vrot.lane.b32.xlu0 %v5214_v39, %s5058_s27  ;;  %v210_v40 = vmul.f32 0.25, %v5214_v39  ;;  %v286_v6 = vcombine.high %v211_v43, %v5057_v34  ;;  %v293_v17 = vrot.slane %v211_v43, %v5242_v54 }
 0x20c   :  { %458 = vrot.lane.b32.xlu1 %v5214_v39, %s5059_s28  ;;  %v220_v53 = vcombine.high %v210_v40, %v5057_v34  ;;  %v227_v58 = vrot.slane %v210_v40, %v5242_v54  ;;  %v300_v18 = vrot.slane %v286_v6, %v5242_v54 }
 0x20e   :  { %214 = vrot.lane.b32.xlu0 %v210_v40, %s5058_s27  ;;  %v234_v59 = vrot.slane %v220_v53, %v5242_v54 }
 0x27a   :  { %v5224_v41 = vpop.permute.xlu1 %456 }
 0x27b   :  { %464 = vrot.lane.b32.xlu0 %v5224_v41, %s5059_s28 }
 0x27c   :  { %v5228_v42 = vpop.permute.xlu0 %454 }
 0x27d   :  { %462 = vrot.lane.b32.xlu1 %v5228_v42, %s5059_s28 }
 0x27e   :  { %v459_v1 = vpop.permute.xlu1 %458 }
 0x27f   :  { %v470_v7 = vcombine.high %v459_v1, %v5057_v34  ;;  %v477_v12 = vrot.slane %v459_v1, %v5242_v54 }
 0x280   :  { %v215_v47 = vpop.permute.xlu0 %214 }
 0x281   :  { %460 = vrot.lane.b32.xlu1 %v5212_v37, %s5059_s28  ;;  %v235_v52 = vcombine.high %v215_v47, %v5057_v34  ;;  %v242_v56 = vrot.slane %v215_v47, %v5242_v54  ;;  %v484_v19 = vrot.slane %v470_v7, %v5242_v54 }
 0x283   :  { %v249_v57 = vrot.slane %v235_v52, %v5242_v54  ;;  %v250_v61 = vcombine.low %v227_v58, %v242_v56  ;;  %v251_v62 = vcombine.high %v227_v58, %v242_v56 }
 0x285   :  { %216 = vrot.lane.b32.xlu1 %v211_v43, %s5058_s27  ;;  %v266_v63 = vcombine.low %v234_v59, %v249_v57  ;;  %v267_v0 = vcombine.high %v234_v59, %v249_v57  ;;  %v258_v2 = vrot.slane %v250_v61, %v5248_v60  ;;  %v265_v3 = vrot.slane %v251_v62, %v5248_v60 }
 0x287   :  { %v274_v4 = vrot.slane %v266_v63, %v5248_v60  ;;  %v281_v5 = vrot.slane %v267_v0, %v5248_v60  ;;  %v352_v8 = vcombine.low %v258_v2, %v265_v3  ;;  %v4535_v16 = vcombine.high %v258_v2, %v265_v3 }
 0x289   :  { %v368_v9 = vcombine.low %v274_v4, %v281_v5  ;;  %v4536_v10 = vcombine.high %v274_v4, %v281_v5  ;;  %v5264_v23 = vrot.slane %v352_v8, %v5242_v54  ;;  %v5276_v35 = vrot.slane %v4535_v16, %v5242_v54 }
 0x28b   :  { %v5267_v24 = vrot.slane %v368_v9, %v5242_v54  ;;  %v5270_v25 = vrot.slane %v4536_v10, %v5242_v54 }
 0x28d   :  { %v392_v56 = vcombine.low %v5267_v24, %v5270_v25 }
 0x2ed   :  { %v465_v13 = vpop.permute.xlu0 %464 }
 0x2ee   :  { %v551_v26 = vcombine.high %v465_v13, %v5057_v34  ;;  %v558_v36 = vrot.slane %v465_v13, %v5242_v54 }
 0x2ef   :  { %v463_v11 = vpop.permute.xlu1 %462 }
 0x2f0   :  { %v485_v14 = vcombine.high %v463_v11, %v5057_v34  ;;  %v492_v15 = vrot.slane %v463_v11, %v5242_v54  ;;  %v565_v47 = vrot.slane %v551_v26, %v5242_v54 }
 0x2f2   :  { %v499_v20 = vrot.slane %v485_v14, %v5242_v54  ;;  %v500_v21 = vcombine.low %v477_v12, %v492_v15  ;;  %v501_v22 = vcombine.high %v477_v12, %v492_v15 }
 0x2f3   :  { %v461_v27 = vpop.permute.xlu1 %460 }
 0x2f4   :  { %v508_v28 = vrot.slane %v500_v21, %v5248_v60  ;;  %v515_v29 = vrot.slane %v501_v22, %v5248_v60  ;;  %v516_v30 = vcombine.low %v484_v19, %v499_v20  ;;  %v517_v32 = vcombine.high %v484_v19, %v499_v20 }
 0x2f5   :  { %v536_v38 = vcombine.high %v461_v27, %v5057_v34  ;;  %v543_v40 = vrot.slane %v461_v27, %v5242_v54 }
 0x2f6   :  { %v524_v43 = vrot.slane %v516_v30, %v5248_v60  ;;  %v531_v44 = vrot.slane %v517_v32, %v5248_v60  ;;  %v602_v45 = vcombine.low %v508_v28, %v515_v29  ;;  %v4539_v46 = vcombine.high %v508_v28, %v515_v29 }
 0x2f7   :  { %v550_v48 = vrot.slane %v536_v38, %v5242_v54  ;;  %v566_v49 = vcombine.low %v543_v40, %v558_v36  ;;  %v567_v50 = vcombine.high %v543_v40, %v558_v36  ;;  %v217_v51 = vpop.permute.xlu1 %216  ;;  %v384_v30 = vcombine.low %v5264_v23, %v5276_v35 }
 0x2f8   :  { %v609_v52 = vrot.slane %v602_v45, %v5242_v54  ;;  %v618_v53 = vcombine.low %v524_v43, %v531_v44  ;;  %v4540_v55 = vcombine.high %v524_v43, %v531_v44  ;;  %v617_v62 = vrot.slane %v4539_v46, %v5242_v54 }
 0x2f9   :  { %v574_v57 = vrot.slane %v566_v49, %v5248_v60  ;;  %v581_v58 = vrot.slane %v567_v50, %v5248_v60  ;;  %v582_v59 = vcombine.low %v550_v48, %v565_v47  ;;  %v583_v61 = vcombine.high %v550_v48, %v565_v47 }
 0x2fa   :  { %v301_v63 = vcombine.high %v217_v51, %v5057_v34  ;;  %v308_v0 = vrot.slane %v217_v51, %v5242_v54  ;;  %v625_v1 = vrot.slane %v618_v53, %v5242_v54  ;;  %v633_v9 = vrot.slane %v4540_v55, %v5242_v54 }
 0x2fb   :  { %v590_v2 = vrot.slane %v582_v59, %v5248_v60  ;;  %v597_v3 = vrot.slane %v583_v61, %v5248_v60  ;;  %v652_v4 = vcombine.low %v574_v57, %v581_v58  ;;  %v4541_v5 = vcombine.high %v574_v57, %v581_v58 }
 0x2fc   :  { %v315_v6 = vrot.slane %v301_v63, %v5242_v54  ;;  %v316_v7 = vcombine.low %v293_v17, %v308_v0  ;;  %v317_v8 = vcombine.high %v293_v17, %v308_v0  ;;  %v634_v17 = vcombine.low %v609_v52, %v617_v62  ;;  %v4547_v62 = vld [vmem:[%s5981_s30] ss:$0 sm:$0xff]  ;;  %v4549_v0 = vld [vmem:[%s5981_s30 + $0x2] ss:$0 sm:$0xff] }
 0x2fd   :  { %v659_v10 = vrot.slane %v652_v4, %v5242_v54  ;;  %v667_v11 = vrot.slane %v4541_v5, %v5242_v54  ;;  %v668_v12 = vcombine.low %v590_v2, %v597_v3  ;;  %v4542_v13 = vcombine.high %v590_v2, %v597_v3  ;;  %v4548_v3 = vld [vmem:[%s5981_s30 + $0x1] ss:$0 sm:$0xff] }
 0x2fe   :  { %v324_v14 = vrot.slane %v316_v7, %v5248_v60  ;;  %v331_v15 = vrot.slane %v317_v8, %v5248_v60  ;;  %v332_v16 = vcombine.low %v300_v18, %v315_v6  ;;  %v333_v19 = vcombine.high %v300_v18, %v315_v6 }
 0x2ff   :  { %v675_v20 = vrot.slane %v668_v12, %v5242_v54  ;;  %v683_v21 = vrot.slane %v4542_v13, %v5242_v54  ;;  %v684_v22 = vcombine.low %v659_v10, %v667_v11  ;;  %v642_v29 = vcombine.low %v625_v1, %v633_v9  ;;  %v4550_v12 = vld [vmem:[%s5981_s30 + $0x3] ss:$0 sm:$0xff] }
 0x300   :  { %v340_v24 = vrot.slane %v332_v16, %v5248_v60  ;;  %v347_v25 = vrot.slane %v333_v19, %v5248_v60  ;;  %v402_v26 = vcombine.low %v324_v14, %v331_v15  ;;  %v4537_v27 = vcombine.high %v324_v14, %v331_v15 }
 0x301   :  { %v692_v28 = vcombine.low %v675_v20, %v683_v21  ;;  %v691_v40 = vrot.slane %v684_v22, %v5248_v60  ;;  %v641_v43 = vrot.slane %v634_v17, %v5248_v60  ;;  %v649_v44 = vrot.slane %v642_v29, %v5248_v60 }
 0x302   :  { %v409_v18 = vrot.slane %v402_v26, %v5242_v54  ;;  %v417_v32 = vrot.slane %v4537_v27, %v5242_v54  ;;  %v418_v36 = vcombine.low %v340_v24, %v347_v25  ;;  %v4538_v38 = vcombine.high %v340_v24, %v347_v25 }
 0x303   :  { %v699_v45 = vrot.slane %v692_v28, %v5248_v60  ;;  %v399_v23 = vrot.slane %v392_v56, %v5248_v60  ;;  %v650_v35 = vcombine.low %v641_v43, %v649_v44  ;;  %v391_v51 = vrot.slane %v384_v30, %v5248_v60 }
 0x304   :  { %v425_v46 = vrot.slane %v418_v36, %v5242_v54  ;;  %v433_v47 = vrot.slane %v4538_v38, %v5242_v54  ;;  %v434_v48 = vcombine.low %v409_v18, %v417_v32  ;;  %v651_v57 = vcombine.high %v641_v43, %v649_v44 }
 0x305   :  { %v700_v49 = vcombine.low %v691_v40, %v699_v45  ;;  %4766 = vmatpush3.xpose.msk.msra.mxu1 %vm970_vm2, %v650_v35  ;;  %v400_v53 = vcombine.low %v391_v51, %v399_v23  ;;  %v401_v58 = vcombine.high %v391_v51, %v399_v23  ;;  %v701_v59 = vcombine.high %v691_v40, %v699_v45 }
 0x306   :  { %v442_v50 = vcombine.low %v425_v46, %v433_v47  ;;  %v441_v52 = vrot.slane %v434_v48, %v5248_v60  ;;  %4770 = vmatprep.subr.mxu1 %v5057_v34 }
 0x307   :  { %4776 = vmatpush3.xpose.msk.msra.mxu0 %vm970_vm2, %v700_v49 }
 0x308   :  { %v449_v55 = vrot.slane %v442_v50, %v5248_v60  ;;  %4785 = vmatprep.subr.mxu0 %v5057_v34  ;;  %4768 = vmatmul.mubr.msk.f32.vlgmr.msra.gmra.mxu1 %vm970_vm2, %v400_v53 }
 0x309   :  { %4771 = vmatpush3.xpose.msk.msra.mxu1 %vm970_vm2, %v651_v57  ;;  %4772 = vmatprep.mubr.msk.f32.mxu1 %vm5060_vm1, %v5057_v34 }
 0x30a   :  { %v450_v56 = vcombine.low %v441_v52, %v449_v55  ;;  %4780 = vmatprep.subr.mxu1 %v5057_v34  ;;  %v451_v61 = vcombine.high %v441_v52, %v449_v55 }
 0x30c   :  { %4778 = vmatmul.mubr.msk.f32.vlgmr.msra.gmra.mxu0 %vm970_vm2, %v450_v56  ;;  %4773 = vmatmul.mubr.msk.f32.vlgmr.msra.gmra.mxu1 %vm970_vm2, %v401_v58 }
 0x30d   :  { %4787 = vmatprep.mubr.msk.f32.mxu0 %vm5060_vm1, %v5057_v34  ;;  %4781 = vmatpush3.xpose.msk.msra.mxu1 %vm970_vm2, %v701_v59 }
 0x30e   :  { %4782 = vmatprep.mubr.msk.f32.mxu1 %vm5060_vm1, %v5057_v34  ;;  %4790 = vmatprep.subr.mxu1 %v5057_v34 }
 0x310   :  { %4783 = vmatmul.mubr.msk.f32.vlgmr.msra.gmra.mxu1 %vm970_vm2, %v451_v61 }
 0x311   :  { %4792 = vmatprep.mubr.msk.f32.mxu1 %vm5060_vm1, %v5057_v34 }
 0x3c8   :  { %v1043_v63 = vpop.f32.mrf.mxu1 }
 0x3c9   :  { %v1044_v1 = vadd.f32 %v4547_v62, %v1043_v63 }
 0x3ca   :  { %v4769_v2 = vpop.f32.mrf.mxu1 }
 0x3cb   :  { %v1276_v5 = vsel %vm1275_vm3, %v1044_v1, -inf }
 0x3cc   :  { %v1195_v4 = vpop.f32.mrf.mxu0  ;;  %v1119_v7 = vpop.f32.mrf.mxu1  ;;  %1277 = vmax.xlane.f32.xlu0 %v1276_v5 }
 0x3cd   :  { %v1196_v6 = vadd.f32 %v4549_v0, %v1195_v4  ;;  %v1120_v9 = vadd.f32 %v4548_v3, %v1119_v7 }
 0x3ce   :  { %v4779_v8 = vpop.f32.mrf.mxu0  ;;  %v4774_v11 = vpop.f32.mrf.mxu1 }
 0x3cf   :  { %v1282_v10 = vsel %vm1275_vm3, %v1196_v6, -inf  ;;  %v1279_v13 = vsel %vm1275_vm3, %v1120_v9, -inf }
 0x3d0   :  { %v1271_v14 = vpop.f32.mrf.mxu1  ;;  %1280 = vmax.xlane.f32.xlu1 %v1279_v13  ;;  %1283 = vmax.xlane.f32.xlu0 %v1282_v10 }
 0x3d1   :  { %v1272_v15 = vadd.f32 %v4550_v12, %v1271_v14 }
 0x3d2   :  { %v4784_v16 = vpop.f32.mrf.mxu1 }
 0x3d3   :  { %v1285_v19 = vsel %vm1275_vm3, %v1272_v15, -inf }
 0x3d4   :  { %1286 = vmax.xlane.f32.xlu0 %v1285_v19 }
 0x3e1   :  { %706 = vrot.lane.b32.xlu1 %v5228_v42, %s5063_s2 }
 0x3e5   :  { %704 = vrot.lane.b32.xlu1 %v5212_v37, %s5063_s2 }
 0x455   :  { %v1278_v20 = vpop.xlane.xlu0 %1277 }
 0x456   :  { %v1288_v21 = vsub.f32 %v1044_v1, %v1278_v20 }
 0x458   :  { %v1292_v28 = vmul.f32 1.442695, %v1288_v21 }
 0x459   :  { %v1281_v22 = vpop.xlane.xlu1 %1280  ;;  %v1284_v17 = vpop.xlane.xlu0 %1283 }
 0x45a   :  { %v1289_v24 = vsub.f32 %v1120_v9, %v1281_v22  ;;  %v1290_v25 = vsub.f32 %v1196_v6, %v1284_v17 }
 0x45c   :  { %v1294_v26 = vmul.f32 1.442695, %v1289_v24  ;;  %v1296_v27 = vmul.f32 1.442695, %v1290_v25 }
 0x45d   :  { %v1287_v29 = vpop.xlane.xlu0 %1286  ;;  %v707_v45 = vpop.permute.xlu1 %706 }
 0x45e   :  { %4973 = vpow2.f32 %v1294_v26  ;;  %v1291_v30 = vsub.f32 %v1272_v15, %v1287_v29  ;;  %v729_v23 = vcombine.high %v707_v45, %v5057_v34  ;;  %v736_v51 = vrot.slane %v707_v45, %v5242_v54 }
 0x45f   :  { %4975 = vpow2.f32 %v1296_v27 }
 0x460   :  { %v1298_v18 = vmul.f32 1.442695, %v1291_v30  ;;  %4977 = vpow2.f32 %v1292_v28  ;;  %v743_v52 = vrot.slane %v729_v23, %v5242_v54 }
 0x461   :  { %v705_v46 = vpop.permute.xlu1 %704 }
 0x462   :  { %4979 = vpow2.f32 %v1298_v18  ;;  %v780_v50 = vcombine.high %v705_v46, %v5057_v34 }
 0x464   :  { %v794_v56 = vrot.slane %v780_v50, %v5242_v54 }
 0x46b   :  { %v5360_v42 = vpop.eup %4973 }
 0x46c   :  { %v5362_v32 = vpop.eup %4975  ;;  %v1303_v37 = vsel %vm1275_vm3, %v5360_v42, 0.0 }
 0x46d   :  { %1304 = vadd.xlane.f32.xlu1 %v1303_v37  ;;  %v1306_v36 = vsel %vm1275_vm3, %v5362_v32, 0.0  ;;  %v5368_v38 = vpop.eup %4977 }
 0x46e   :  { %1307 = vadd.xlane.f32.xlu0 %v1306_v36  ;;  %v1300_v44 = vsel %vm1275_vm3, %v5368_v38, 0.0 }
 0x46f   :  { %v5370_v40 = vpop.eup %4979 }
 0x470   :  { %v1309_v43 = vsel %vm1275_vm3, %v5370_v40, 0.0 }
 0x471   :  { %1310 = vadd.xlane.f32.xlu1 %v1309_v43 }
 0x472   :  { %1301 = vadd.xlane.f32.xlu0 %v1300_v44 }
 0x482   :  { %708 = vrot.lane.b32.xlu1 %v5224_v41, %s5063_s2  ;;  %v787_v41 = vrot.slane %v705_v46, %v5242_v54 }
 0x488   :  { %702 = vrot.lane.b32.xlu0 %v5214_v39, %s5063_s2 }
 0x4f6   :  { %v1305_v47 = vpop.xlane.xlu1 %1304 }
 0x4f7   :  { %v1308_v48 = vpop.xlane.xlu0 %1307  ;;  %4981 = vrcp.f32 %v1305_v47 }
 0x4f8   :  { %4983 = vrcp.f32 %v1308_v48 }
 0x4fa   :  { %v1311_v35 = vpop.xlane.xlu1 %1310 }
 0x4fb   :  { %v1302_v49 = vpop.xlane.xlu0 %1301 }
 0x4fc   :  { %4985 = vrcp.f32 %v1302_v49 }
 0x4fd   :  { %4987 = vrcp.f32 %v1311_v35 }
 0x4fe   :  { %v709_v53 = vpop.permute.xlu1 %708 }
 0x4ff   :  { %v795_v39 = vcombine.high %v709_v53, %v5057_v34  ;;  %v802_v55 = vrot.slane %v709_v53, %v5242_v54  ;;  %v703_v57 = vpop.permute.xlu0 %702 }
 0x500   :  { %v714_v58 = vcombine.high %v703_v57, %v5057_v34  ;;  %v721_v59 = vrot.slane %v703_v57, %v5242_v54 }
 0x501   :  { %v809_v61 = vrot.slane %v795_v39, %v5242_v54  ;;  %v810_v62 = vcombine.low %v787_v41, %v802_v55  ;;  %v811_v63 = vcombine.high %v787_v41, %v802_v55 }
 0x502   :  { %v728_v0 = vrot.slane %v714_v58, %v5242_v54  ;;  %v744_v1 = vcombine.low %v721_v59, %v736_v51  ;;  %v745_v2 = vcombine.high %v721_v59, %v736_v51 }
 0x503   :  { %v818_v3 = vrot.slane %v810_v62, %v5248_v60  ;;  %v825_v4 = vrot.slane %v811_v63, %v5248_v60  ;;  %v826_v5 = vcombine.low %v794_v56, %v809_v61  ;;  %v827_v6 = vcombine.high %v794_v56, %v809_v61  ;;  %v1857_v56 = vld [vmem:[%s5954_s6 + $0x18] sm:$0xff] }
 0x504   :  { %v752_v7 = vrot.slane %v744_v1, %v5248_v60  ;;  %v759_v8 = vrot.slane %v745_v2, %v5248_v60  ;;  %v760_v9 = vcombine.low %v728_v0, %v743_v52  ;;  %v761_v10 = vcombine.high %v728_v0, %v743_v52  ;;  %v4982_v44 = vpop.eup %4981 }
 0x505   :  { %v834_v11 = vrot.slane %v826_v5, %v5248_v60  ;;  %v841_v12 = vrot.slane %v827_v6, %v5248_v60  ;;  %v896_v13 = vcombine.low %v818_v3, %v825_v4  ;;  %v4545_v14 = vcombine.high %v818_v3, %v825_v4  ;;  %v4984_v46 = vpop.eup %4983 }
 0x506   :  { %v768_v15 = vrot.slane %v760_v9, %v5248_v60  ;;  %v775_v16 = vrot.slane %v761_v10, %v5248_v60  ;;  %v846_v19 = vcombine.low %v752_v7, %v759_v8  ;;  %v4543_v20 = vcombine.high %v752_v7, %v759_v8 }
 0x507   :  { %v912_v21 = vcombine.low %v834_v11, %v841_v12  ;;  %v4546_v22 = vcombine.high %v834_v11, %v841_v12  ;;  %v903_v27 = vrot.slane %v896_v13, %v5242_v54  ;;  %v911_v28 = vrot.slane %v4545_v14, %v5242_v54 }
 0x508   :  { %v853_v17 = vrot.slane %v846_v19, %v5242_v54  ;;  %v861_v24 = vrot.slane %v4543_v20, %v5242_v54  ;;  %v862_v25 = vcombine.low %v768_v15, %v775_v16  ;;  %v4544_v26 = vcombine.high %v768_v15, %v775_v16  ;;  %v1855_v20 = vld [vmem:[%s5954_s6 + $0x8] sm:$0xff] }
 0x509   :  { %v919_v29 = vrot.slane %v912_v21, %v5242_v54  ;;  %v927_v30 = vrot.slane %v4546_v22, %v5242_v54  ;;  %v928_v47 = vcombine.low %v903_v27, %v911_v28  ;;  %v4986_v48 = vpop.eup %4985  ;;  %v1317_v41 = vmul.f32 %v4982_v44, %v5360_v42 }
 0x50a   :  { %v869_v18 = vrot.slane %v862_v25, %v5242_v54  ;;  %v877_v37 = vrot.slane %v4544_v26, %v5242_v54  ;;  %v878_v36 = vcombine.low %v853_v17, %v861_v24  ;;  %v4988_v49 = vpop.eup %4987  ;;  %v1316_v53 = vmul.f32 %v4986_v48, %v5368_v38  ;;  %v1854_v25 = vld [vmem:[%s5954_s6] sm:$0xff] }
 0x50b   :  { %v936_v43 = vcombine.low %v919_v29, %v927_v30  ;;  %v935_v39 = vrot.slane %v928_v47, %v5248_v60  ;;  %v1318_v38 = vmul.f32 %v4984_v46, %v5362_v32  ;;  %v1319_v42 = vmul.f32 %v4988_v49, %v5370_v40  ;;  %v1856_v32 = vld [vmem:[%s5954_s6 + $0x10] sm:$0xff] }
 0x50c   :  { %v886_v45 = vcombine.low %v869_v18, %v877_v37  ;;  %v885_v23 = vrot.slane %v878_v36, %v5248_v60 }
 0x50d   :  { %v943_v50 = vrot.slane %v936_v43, %v5248_v60 }
 0x50e   :  { %v893_v35 = vrot.slane %v886_v45, %v5248_v60 }
 0x50f   :  { %v944_v55 = vcombine.low %v935_v39, %v943_v50  ;;  %v945_v57 = vcombine.high %v935_v39, %v943_v50 }
 0x510   :  { %v894_v51 = vcombine.low %v885_v23, %v893_v35  ;;  %v895_v52 = vcombine.high %v885_v23, %v893_v35 }
 0x512   :  { %4786 = vmatpush3.msra.mxu0 %v894_v51  ;;  %4791 = vmatpush3.msra.mxu1 %v895_v52 }
 0x513   :  { %4788 = vmatmul.mubr.msk.f32.vlgmr.msra.gmra.mxu0 %vm1275_vm3, %v1316_v53  ;;  %4793 = vmatmul.mubr.msk.f32.vlgmr.msra.gmra.mxu1 %vm1275_vm3, %v1317_v41 }
 0x514   :  { %4795 = vmatprep.subr.mxu0 %v5057_v34  ;;  %4800 = vmatprep.subr.mxu1 %v5057_v34 }
 0x515   :  { %4796 = vmatpush3.msra.mxu0 %v944_v55  ;;  %4801 = vmatpush3.msra.mxu1 %v945_v57 }
 0x516   :  { %4797 = vmatprep.mubr.msk.f32.mxu0 %vm5060_vm1, %v5057_v34  ;;  %4802 = vmatprep.mubr.msk.f32.mxu1 %vm5060_vm1, %v5057_v34 }
 0x517   :  { %4798 = vmatmul.mubr.msk.f32.vlgmr.msra.gmra.mxu0 %vm1275_vm3, %v1318_v38  ;;  %4803 = vmatmul.mubr.msk.f32.vlgmr.msra.gmra.mxu1 %vm1275_vm3, %v1319_v42 }
 0x518   :  { %4805 = vmatprep.subr.mxu0 %v1857_v56 }
 0x519   :  { %4806 = vmatpush3.msra.mxu0 %v1857_v56 }
 0x51a   :  { %4807 = vmatprep.subr.mxu0 %v1856_v32 }
 0x51b   :  { %4808 = vmatpush3.msra.mxu0 %v1856_v32 }
 0x51c   :  { %4809 = vmatprep.subr.mxu0 %v1855_v20 }
 0x51d   :  { %4810 = vmatpush3.msra.mxu0 %v1855_v20 }
 0x51e   :  { %4811 = vmatprep.subr.mxu0 %v1854_v25 }
 0x51f   :  { %4812 = vmatpush3.msra.mxu0 %v1854_v25  ;;  %v1994_v25 = vld [vmem:[%s5958_s10 + $0x10] sm:$0xff] }
 0x5d3   :  { %v1389_v40 = vpop.f32.mrf.mxu0  ;;  %v1462_v58 = vpop.f32.mrf.mxu1 }
 0x5d4   :  { %v1612_v59 = vcombine.high %v1389_v40, %v5057_v34  ;;  %v1619_v61 = vrot.slane %v1389_v40, %v5242_v54  ;;  %v1627_v62 = vcombine.high %v1462_v58, %v5057_v34  ;;  %v1634_v63 = vrot.slane %v1462_v58, %v5242_v54 }
 0x5d5   :  { %v4789_v0 = vpop.f32.mrf.mxu0  ;;  %v4794_v1 = vpop.f32.mrf.mxu1 }
 0x5d6   :  { %v1626_v2 = vrot.slane %v1612_v59, %v5242_v54  ;;  %v1641_v3 = vrot.slane %v1627_v62, %v5242_v54  ;;  %v1642_v4 = vcombine.low %v1619_v61, %v1634_v63  ;;  %v1643_v5 = vcombine.high %v1619_v61, %v1634_v63 }
 0x5d7   :  { %v1535_v6 = vpop.f32.mrf.mxu0  ;;  %v1608_v7 = vpop.f32.mrf.mxu1 }
 0x5d8   :  { %v1650_v8 = vrot.slane %v1642_v4, %v5248_v60  ;;  %v1657_v9 = vrot.slane %v1643_v5, %v5248_v60  ;;  %v1658_v10 = vcombine.low %v1626_v2, %v1641_v3  ;;  %v1659_v11 = vcombine.high %v1626_v2, %v1641_v3  ;;  %v4567_v5 = vld [vmem:[%s5955_s7] ss:$0 sm:$0xff] }
 0x5d9   :  { %v1678_v12 = vcombine.high %v1535_v6, %v5057_v34  ;;  %v1685_v13 = vrot.slane %v1535_v6, %v5242_v54  ;;  %v1693_v14 = vcombine.high %v1608_v7, %v5057_v34  ;;  %v1700_v15 = vrot.slane %v1608_v7, %v5242_v54  ;;  %v4799_v16 = vpop.f32.mrf.mxu0  ;;  %v4804_v19 = vpop.f32.mrf.mxu1 }
 0x5da   :  { %v1666_v21 = vrot.slane %v1658_v10, %v5248_v60  ;;  %v1673_v22 = vrot.slane %v1659_v11, %v5248_v60  ;;  %v1744_v17 = vcombine.low %v1650_v8, %v1657_v9  ;;  %v4563_v24 = vcombine.high %v1650_v8, %v1657_v9 }
 0x5db   :  { %v1692_v26 = vrot.slane %v1678_v12, %v5242_v54  ;;  %v1707_v27 = vrot.slane %v1693_v14, %v5242_v54  ;;  %v1708_v28 = vcombine.low %v1685_v13, %v1700_v15  ;;  %v1709_v29 = vcombine.high %v1685_v13, %v1700_v15 }
 0x5dc   :  { %v1751_v30 = vrot.slane %v1744_v17, %v5242_v54  ;;  %v1759_v18 = vrot.slane %v4563_v24, %v5242_v54  ;;  %v1760_v37 = vcombine.low %v1666_v21, %v1673_v22  ;;  %v4564_v36 = vcombine.high %v1666_v21, %v1673_v22 }
 0x5dd   :  { %v1716_v43 = vrot.slane %v1708_v28, %v5248_v60  ;;  %v1723_v44 = vrot.slane %v1709_v29, %v5248_v60  ;;  %v1724_v45 = vcombine.low %v1692_v26, %v1707_v27  ;;  %v1725_v46 = vcombine.high %v1692_v26, %v1707_v27  ;;  %v1993_v26 = vld [vmem:[%s5958_s10 + $0x8] sm:$0xff]  ;;  %v1992_v27 = vld [vmem:[%s5958_s10] sm:$0xff] }
 0x5de   :  { %v1767_v47 = vrot.slane %v1760_v37, %v5242_v54  ;;  %v1775_v48 = vrot.slane %v4564_v36, %v5242_v54  ;;  %v1776_v23 = vcombine.low %v1751_v30, %v1759_v18 }
 0x5df   :  { %v1732_v35 = vrot.slane %v1724_v45, %v5248_v60  ;;  %v1739_v49 = vrot.slane %v1725_v46, %v5248_v60  ;;  %v1794_v50 = vcombine.low %v1716_v43, %v1723_v44  ;;  %v4565_v51 = vcombine.high %v1716_v43, %v1723_v44  ;;  %v4570_v44 = vld [vmem:[%s5956_s8] ss:$0 sm:$0xff] }
 0x5e0   :  { %v1784_v52 = vcombine.low %v1767_v47, %v1775_v48  ;;  %v1783_v57 = vrot.slane %v1776_v23, %v5248_v60  ;;  %v4571_v46 = vld [vmem:[%s5957_s9] ss:$0 sm:$0xff] }
 0x5e1   :  { %v1801_v53 = vrot.slane %v1794_v50, %v5242_v54  ;;  %v1809_v41 = vrot.slane %v4565_v51, %v5242_v54  ;;  %v1810_v39 = vcombine.low %v1732_v35, %v1739_v49  ;;  %v4566_v55 = vcombine.high %v1732_v35, %v1739_v49  ;;  %v2101_v51 = vld [vmem:[%s5960_s12 + $0x38] sm:$0xff] }
 0x5e2   :  { %v1791_v38 = vrot.slane %v1784_v52, %v5248_v60  ;;  %4827 = vmatprep.subr.mxu0 %v2101_v51  ;;  %v2100_v52 = vld [vmem:[%s5960_s12 + $0x30] sm:$0xff] }
 0x5e3   :  { %v1817_v42 = vrot.slane %v1810_v39, %v5242_v54  ;;  %v1825_v56 = vrot.slane %v4566_v55, %v5242_v54  ;;  %v1826_v32 = vcombine.low %v1801_v53, %v1809_v41  ;;  %v2099_v53 = vld [vmem:[%s5960_s12 + $0x28] sm:$0xff]  ;;  %v2098_v41 = vld [vmem:[%s5960_s12 + $0x20] sm:$0xff]  ;;  %v2097_v39 = vld [vmem:[%s5960_s12 + $0x18] sm:$0xff] }
 0x5e4   :  { %v1793_v40 = vcombine.high %v1783_v57, %v1791_v38  ;;  %v1792_v58 = vcombine.low %v1783_v57, %v1791_v38  ;;  %v2096_v55 = vld [vmem:[%s5960_s12 + $0x10] sm:$0xff]  ;;  %v2095_v57 = vld [vmem:[%s5960_s12 + $0x8] sm:$0xff]  ;;  %v2094_v38 = vld [vmem:[%s5960_s12] sm:$0xff] }
 0x5e5   :  { %v1834_v59 = vcombine.low %v1817_v42, %v1825_v56  ;;  %v1833_v61 = vrot.slane %v1826_v32, %v5248_v60  ;;  %v4572_v42 = vld [vmem:[%s5959_s11] ss:$0 sm:$0xff] }
 0x5e6   :  { %1846 = vrot.lane.b32.xlu0 %v1793_v40, %s5064_s23 }
 0x5e7   :  { %v1841_v62 = vrot.slane %v1834_v59, %v5248_v60 }
 0x5e9   :  { %v1843_v63 = vcombine.high %v1833_v61, %v1841_v62  ;;  %v1842_v0 = vcombine.low %v1833_v61, %v1841_v62 }
 0x5eb   :  { %1848 = vrot.lane.b32.xlu1 %v1843_v63, %s5064_s23 }
 0x658   :  { %v1847_v1 = vpop.permute.xlu0 %1846 }
 0x659   :  { %v1852_v2 = vsel %vm970_vm2, %v1792_v58, %v1847_v1 }
 0x65a   :  { %4813 = vmatprep.mubr.msk.f32.mxu0 %vm74_vm0, %v1852_v2 }
 0x65d   :  { %v1849_v3 = vpop.permute.xlu1 %1848 }
 0x65e   :  { %v1853_v4 = vsel %vm970_vm2, %v1842_v0, %v1849_v3 }
 0x65f   :  { %4814 = vmatmul.mubr.msk.f32.vlgmr.msra.gmra.mxu0 %vm74_vm0, %v1853_v4 }
 0x660   :  { %4828 = vmatpush3.msra.mxu0 %v2101_v51 }
 0x661   :  { %4829 = vmatprep.subr.mxu0 %v2100_v52 }
 0x662   :  { %4830 = vmatpush3.msra.mxu0 %v2100_v52  ;;  %v4585_v52 = vld [vmem:[%s5953_s5 + $0x1] ss:$0 sm:$0xff] }
 0x663   :  { %4831 = vmatprep.subr.mxu0 %v2099_v53 }
 0x664   :  { %4832 = vmatpush3.msra.mxu0 %v2099_v53 }
 0x665   :  { %4833 = vmatprep.subr.mxu0 %v2098_v41 }
 0x666   :  { %4834 = vmatpush3.msra.mxu0 %v2098_v41 }
 0x667   :  { %4835 = vmatprep.subr.mxu0 %v2097_v39 }
 0x668   :  { %4836 = vmatpush3.msra.mxu0 %v2097_v39 }
 0x669   :  { %4837 = vmatprep.subr.mxu0 %v2096_v55 }
 0x66a   :  { %4838 = vmatpush3.msra.mxu0 %v2096_v55 }
 0x66b   :  { %4839 = vmatprep.subr.mxu0 %v2095_v57 }
 0x66c   :  { %4840 = vmatpush3.msra.mxu0 %v2095_v57 }
 0x66d   :  { %4841 = vmatprep.subr.mxu0 %v2094_v38 }
 0x66e   :  { %4842 = vmatpush3.msra.mxu0 %v2094_v38 }
 0x66f   :  { %4867 = vmatprep.subr.mxu0 %v5057_v34 }
 0x71f   :  { %v4815_v6 = vpop.f32.mrf.mxu0 }
 0x720   :  { %v1943_v7 = vadd.f32 %v4815_v6, %v4567_v5  ;;  %v4575_v6 = vld [vmem:[%s5961_s13] ss:$0 sm:$0xff] }
 0x721   :  { %v1937_v8 = vpop.f32.mrf.mxu0 }
 0x722   :  { %v1938_v9 = vadd.f32 %v4567_v5, %v1937_v8  ;;  %v1947_v10 = vadd.f32 %v1943_v7, %v5203_v33 }
 0x724   :  { %v1953_v11 = vsel %vm74_vm0, %v1947_v10, 0.0  ;;  %v1946_v12 = vadd.f32 %v1938_v9, %v5199_v31  ;;  %v1995_v31 = vld [vmem:[%s5958_s10 + $0x18] sm:$0xff] }
 0x725   :  { %1954 = vadd.xlane.f32.xlu1 %v1953_v11  ;;  %4816 = vmatprep.subr.mxu1 %v1995_v31 }
 0x726   :  { %v1950_v13 = vsel %vm74_vm0, %v1946_v12, 0.0  ;;  %4817 = vmatpush3.msra.mxu1 %v1995_v31 }
 0x727   :  { %1951 = vadd.xlane.f32.xlu0 %v1950_v13  ;;  %4818 = vmatprep.subr.mxu1 %v1994_v25 }
 0x728   :  { %4819 = vmatpush3.msra.mxu1 %v1994_v25  ;;  %v4583_v25 = vld [vmem:[%s5978_s26 + $0x38] sm:$0xff] }
 0x729   :  { %4820 = vmatprep.subr.mxu1 %v1993_v26 }
 0x72a   :  { %4821 = vmatpush3.msra.mxu1 %v1993_v26  ;;  %v4582_v26 = vld [vmem:[%s5978_s26 + $0x30] sm:$0xff] }
 0x72b   :  { %4822 = vmatprep.subr.mxu1 %v1992_v27 }
 0x72c   :  { %4823 = vmatpush3.msra.mxu1 %v1992_v27  ;;  %v4581_v27 = vld [vmem:[%s5978_s26 + $0x28] sm:$0xff] }
 0x72d   :  { %4846 = vmatprep.subr.mxu1 %v4583_v25 }
 0x7ae   :  { %v1955_v14 = vpop.xlane.xlu1 %1954 }
 0x7af   :  { %v1957_v15 = vmul.f32 0.03125, %v1955_v14 }
 0x7b0   :  { %v1952_v16 = vpop.xlane.xlu0 %1951 }
 0x7b1   :  { %v1956_v19 = vmul.f32 0.03125, %v1952_v16  ;;  %v1959_v20 = vsub.f32 %v1947_v10, %v1957_v15 }
 0x7b3   :  { %v1958_v21 = vsub.f32 %v1946_v12, %v1956_v19  ;;  %v1961_v24 = vmul.f32 %v1959_v20, %v1959_v20 }
 0x7b5   :  { %v1960_v22 = vmul.f32 %v1958_v21, %v1958_v21  ;;  %v1965_v33 = vsel %vm74_vm0, %v1961_v24, 0.0 }
 0x7b7   :  { %v1962_v17 = vsel %vm74_vm0, %v1960_v22, 0.0 }
 0x7b8   :  { %1963 = vadd.xlane.f32.xlu0 %v1962_v17 }
 0x7bc   :  { %1966 = vadd.xlane.f32.xlu0 %v1965_v33 }
 0x841   :  { %v1964_v28 = vpop.xlane.xlu0 %1963 }
 0x842   :  { %v1968_v29 = vmul.f32 0.03125, %v1964_v28  ;;  %v4580_v28 = vld [vmem:[%s5978_s26 + $0x20] sm:$0xff] }
 0x844   :  { %v1970_v30 = vadd.f32 1e-05, %v1968_v29 }
 0x845   :  { %v1967_v18 = vpop.xlane.xlu0 %1966 }
 0x846   :  { %4989 = vrsqrt.f32 %v1970_v30  ;;  %v1969_v37 = vmul.f32 0.03125, %v1967_v18 }
 0x848   :  { %v1971_v36 = vadd.f32 1e-05, %v1969_v37 }
 0x84a   :  { %4991 = vrsqrt.f32 %v1971_v36 }
 0x853   :  { %v4990_v43 = vpop.eup %4989 }
 0x854   :  { %v1974_v45 = vmul.f32 %v4990_v43, %v1958_v21 }
 0x856   :  { %v1982_v47 = vmul.f32 %v4570_v44, %v1974_v45  ;;  %v4578_v45 = vld [vmem:[%s5962_s14] ss:$0 sm:$0xff] }
 0x857   :  { %v4992_v48 = vpop.eup %4991 }
 0x858   :  { %v1975_v23 = vmul.f32 %v4992_v48, %v1959_v20  ;;  %v1990_v35 = vadd.f32 %v4571_v46, %v1982_v47 }
 0x85a   :  { %v1983_v49 = vmul.f32 %v4570_v44, %v1975_v23  ;;  %4824 = vmatprep.mubr.msk.f32.mxu1 %vm74_vm0, %v1990_v35 }
 0x85c   :  { %v1991_v50 = vadd.f32 %v4571_v46, %v1983_v49 }
 0x85e   :  { %4825 = vmatmul.mubr.msk.f32.vlgmr.msra.gmra.mxu1 %vm74_vm0, %v1991_v50 }
 0x85f   :  { %4847 = vmatpush3.msra.mxu1 %v4583_v25 }
 0x860   :  { %4848 = vmatprep.subr.mxu1 %v4582_v26 }
 0x861   :  { %4849 = vmatpush3.msra.mxu1 %v4582_v26 }
 0x862   :  { %4850 = vmatprep.subr.mxu1 %v4581_v27 }
 0x863   :  { %4851 = vmatpush3.msra.mxu1 %v4581_v27 }
 0x864   :  { %4852 = vmatprep.subr.mxu1 %v4580_v28 }
 0x865   :  { %4853 = vmatpush3.msra.mxu1 %v4580_v28 }
 0x866   :  { %4857 = vmatprep.subr.mxu1 %v5057_v34 }
 0x91e   :  { %v4826_v56 = vpop.f32.mrf.mxu1 }
 0x91f   :  { %v2081_v32 = vadd.f32 %v4826_v56, %v4572_v42 }
 0x920   :  { %v2075_v40 = vpop.f32.mrf.mxu1 }
 0x921   :  { %v2087_v58 = vmul.f32 0.70710677, %v2081_v32  ;;  %v2076_v59 = vadd.f32 %v4572_v42, %v2075_v40  ;;  %v2085_v3 = vmul.f32 0.5, %v2081_v32 }
 0x923   :  { %4993 = verf.f32 %v2087_v58  ;;  %v2086_v61 = vmul.f32 0.70710677, %v2076_v59  ;;  %v2084_v1 = vmul.f32 0.5, %v2076_v59 }
 0x925   :  { %4995 = verf.f32 %v2086_v61 }
 0x930   :  { %v4994_v62 = vpop.eup %4993 }
 0x931   :  { %v2091_v0 = vadd.f32 1.0, %v4994_v62 }
 0x932   :  { %v4996_v63 = vpop.eup %4995 }
 0x933   :  { %v2090_v2 = vadd.f32 1.0, %v4996_v63  ;;  %v2093_v5 = vmul.f32 %v2091_v0, %v2085_v3 }
 0x935   :  { %v2092_v4 = vmul.f32 %v2090_v2, %v2084_v1 }
 0x937   :  { %4843 = vmatprep.mubr.msk.f32.mxu0 %vm2109_vm4, %v2092_v4 }
 0x938   :  { %4844 = vmatmul.mubr.msk.f32.vlgmr.msra.gmra.mxu0 %vm2109_vm4, %v2093_v5 }
 0x939   :  { %4869 = vmatprep.mubr.msk.f32.mxu0 %vm5060_vm1, %v5057_v34 }
 0x9f8   :  { %v4845_v7 = vpop.f32.mrf.mxu0 }
 0x9f9   :  { %v2188_v8 = vadd.f32 %v4845_v7, %v4575_v6 }
 0x9fa   :  { %v2182_v9 = vpop.f32.mrf.mxu0 }
 0x9fb   :  { %v2183_v10 = vadd.f32 %v4575_v6, %v2182_v9  ;;  %v2192_v11 = vadd.f32 %v2188_v8, %v1991_v50 }
 0x9fd   :  { %v2198_v12 = vsel %vm74_vm0, %v2192_v11, 0.0  ;;  %v2191_v13 = vadd.f32 %v2183_v10, %v1990_v35  ;;  %v4579_v35 = vld [vmem:[%s5963_s15] ss:$0 sm:$0xff] }
 0x9fe   :  { %2199 = vadd.xlane.f32.xlu1 %v2198_v12 }
 0x9ff   :  { %v2195_v14 = vsel %vm74_vm0, %v2191_v13, 0.0 }
 0xa00   :  { %2196 = vadd.xlane.f32.xlu0 %v2195_v14 }
 0xa87   :  { %v2200_v15 = vpop.xlane.xlu1 %2199 }
 0xa88   :  { %v2202_v16 = vmul.f32 0.03125, %v2200_v15 }
 0xa89   :  { %v2197_v19 = vpop.xlane.xlu0 %2196 }
 0xa8a   :  { %v2204_v20 = vsub.f32 %v2192_v11, %v2202_v16  ;;  %v2201_v21 = vmul.f32 0.03125, %v2197_v19 }
 0xa8c   :  { %v2203_v22 = vsub.f32 %v2191_v13, %v2201_v21  ;;  %v2206_v17 = vmul.f32 %v2204_v20, %v2204_v20 }
 0xa8e   :  { %v2210_v24 = vsel %vm74_vm0, %v2206_v17, 0.0  ;;  %v2205_v33 = vmul.f32 %v2203_v22, %v2203_v22 }
 0xa8f   :  { %2211 = vadd.xlane.f32.xlu1 %v2210_v24 }
 0xa90   :  { %v2207_v31 = vsel %vm74_vm0, %v2205_v33, 0.0 }
 0xa91   :  { %2208 = vadd.xlane.f32.xlu0 %v2207_v31 }
 0xb18   :  { %v2212_v29 = vpop.xlane.xlu1 %2211 }
 0xb19   :  { %v2214_v30 = vmul.f32 0.03125, %v2212_v29 }
 0xb1a   :  { %v2209_v18 = vpop.xlane.xlu0 %2208 }
 0xb1b   :  { %v2216_v37 = vadd.f32 1e-05, %v2214_v30  ;;  %v2213_v36 = vmul.f32 0.03125, %v2209_v18 }
 0xb1d   :  { %4997 = vrsqrt.f32 %v2216_v37  ;;  %v2215_v43 = vadd.f32 1e-05, %v2213_v36 }
 0xb1f   :  { %4999 = vrsqrt.f32 %v2215_v43 }
 0xb2a   :  { %v4998_v44 = vpop.eup %4997 }
 0xb2b   :  { %v2220_v46 = vmul.f32 %v4998_v44, %v2204_v20 }
 0xb2c   :  { %v5000_v47 = vpop.eup %4999 }
 0xb2d   :  { %v2219_v48 = vmul.f32 %v5000_v47, %v2203_v22  ;;  %v2228_v23 = vmul.f32 %v4578_v45, %v2220_v46 }
 0xb2f   :  { %v2227_v49 = vmul.f32 %v4578_v45, %v2219_v48  ;;  %v5565_v51 = vadd.f32 %v4579_v35, %v2228_v23 }
 0xb31   :  { %v5563_v50 = vadd.f32 %v4579_v35, %v2227_v49 }
 0xb33   :  { %4854 = vmatprep.mubr.msk.f32.mxu1 %vm74_vm0, %v5563_v50 }
 0xb34   :  { %4855 = vmatmul.mubr.msk.f32.vlgmr.msra.gmra.mxu1 %vm74_vm0, %v5565_v51 }
 0xb35   :  { %4859 = vmatprep.mubr.msk.f32.mxu1 %vm5060_vm1, %v5057_v34 }
 0xbf4   :  { %v4856_v53 = vpop.f32.mrf.mxu1 }
 0xbf5   :  { %v5576_v41 = vadd.f32 %v4856_v53, %v4585_v52 }
 0xbf6   :  { %v2322_v39 = vpop.f32.mrf.mxu1 }
 0xbf7   :  { %v5578_v55 = vadd.f32 %v4585_v52, %v2322_v39  ;;  %2577 = vrot.lane.b32.xlu1 %v5576_v41, %s5058_s27  ;;  %v2332_v56 = vmul.f32 0.25, %v5576_v41 }
 0xbf9   :  { %2575 = vrot.lane.b32.xlu0 %v5578_v55, %s5058_s27  ;;  %v2331_v57 = vmul.f32 0.25, %v5578_v55  ;;  %v2407_v20 = vcombine.high %v2332_v56, %v5057_v34  ;;  %v2414_v37 = vrot.slane %v2332_v56, %v5242_v54 }
 0xbfb   :  { %2579 = vrot.lane.b32.xlu1 %v5578_v55, %s5059_s28  ;;  %v2341_v58 = vcombine.high %v2331_v57, %v5057_v34  ;;  %v2348_v63 = vrot.slane %v2331_v57, %v5242_v54  ;;  %v2421_v36 = vrot.slane %v2407_v20, %v5242_v54 }
 0xbfd   :  { %2335 = vrot.lane.b32.xlu0 %v2331_v57, %s5058_s27  ;;  %v2355_v61 = vrot.slane %v2341_v58, %v5242_v54 }
 0xc69   :  { %v5588_v38 = vpop.permute.xlu1 %2577 }
 0xc6a   :  { %2585 = vrot.lane.b32.xlu0 %v5588_v38, %s5059_s28 }
 0xc6b   :  { %v5592_v42 = vpop.permute.xlu0 %2575 }
 0xc6c   :  { %2583 = vrot.lane.b32.xlu1 %v5592_v42, %s5059_s28 }
 0xc6d   :  { %v2580_v10 = vpop.permute.xlu1 %2579 }
 0xc6e   :  { %v2591_v15 = vcombine.high %v2580_v10, %v5057_v34  ;;  %v2598_v22 = vrot.slane %v2580_v10, %v5242_v54 }
 0xc6f   :  { %v2336_v32 = vpop.permute.xlu0 %2335 }
 0xc70   :  { %2581 = vrot.lane.b32.xlu1 %v5576_v41, %s5059_s28  ;;  %v2356_v40 = vcombine.high %v2336_v32, %v5057_v34  ;;  %v2363_v62 = vrot.slane %v2336_v32, %v5242_v54  ;;  %v2605_v25 = vrot.slane %v2591_v15, %v5242_v54 }
 0xc72   :  { %v2370_v59 = vrot.slane %v2356_v40, %v5242_v54  ;;  %v2371_v2 = vcombine.low %v2348_v63, %v2363_v62  ;;  %v2372_v3 = vcombine.high %v2348_v63, %v2363_v62 }
 0xc74   :  { %2337 = vrot.lane.b32.xlu1 %v2332_v56, %s5058_s27  ;;  %v2387_v0 = vcombine.low %v2355_v61, %v2370_v59  ;;  %v2388_v1 = vcombine.high %v2355_v61, %v2370_v59  ;;  %v2379_v6 = vrot.slane %v2371_v2, %v5248_v60  ;;  %v2386_v7 = vrot.slane %v2372_v3, %v5248_v60 }
 0xc76   :  { %v2395_v4 = vrot.slane %v2387_v0, %v5248_v60  ;;  %v2402_v5 = vrot.slane %v2388_v1, %v5248_v60  ;;  %v2473_v11 = vcombine.low %v2379_v6, %v2386_v7  ;;  %v4588_v12 = vcombine.high %v2379_v6, %v2386_v7 }
 0xc78   :  { %v2489_v8 = vcombine.low %v2395_v4, %v2402_v5  ;;  %v4589_v9 = vcombine.high %v2395_v4, %v2402_v5  ;;  %v5614_v16 = vrot.slane %v2473_v11, %v5242_v54  ;;  %v5617_v19 = vrot.slane %v4588_v12, %v5242_v54 }
 0xc7a   :  { %v2496_v13 = vrot.slane %v2489_v8, %v5242_v54  ;;  %v2504_v14 = vrot.slane %v4589_v9, %v5242_v54  ;;  %v2505_v29 = vcombine.low %v5614_v16, %v5617_v19 }
 0xc7c   :  { %v2513_v31 = vcombine.low %v2496_v13, %v2504_v14 }
 0xc7e   :  { %v5636_v35 = vrot.slane %v2513_v31, %v5248_v60 }
 0xcdc   :  { %v2586_v17 = vpop.permute.xlu0 %2585 }
 0xcdd   :  { %v2672_v30 = vcombine.high %v2586_v17, %v5057_v34  ;;  %v2679_v47 = vrot.slane %v2586_v17, %v5242_v54 }
 0xcde   :  { %v2584_v21 = vpop.permute.xlu1 %2583 }
 0xcdf   :  { %v2606_v24 = vcombine.high %v2584_v21, %v5057_v34  ;;  %v2613_v33 = vrot.slane %v2584_v21, %v5242_v54  ;;  %v2686_v57 = vrot.slane %v2672_v30, %v5242_v54 }
 0xce1   :  { %v2620_v26 = vrot.slane %v2606_v24, %v5242_v54  ;;  %v2621_v27 = vcombine.low %v2598_v22, %v2613_v33  ;;  %v2622_v28 = vcombine.high %v2598_v22, %v2613_v33 }
 0xce2   :  { %v2582_v18 = vpop.permute.xlu1 %2581 }
 0xce3   :  { %v2629_v43 = vrot.slane %v2621_v27, %v5248_v60  ;;  %v2636_v44 = vrot.slane %v2622_v28, %v5248_v60  ;;  %v2637_v45 = vcombine.low %v2605_v25, %v2620_v26  ;;  %v2638_v46 = vcombine.high %v2605_v25, %v2620_v26 }
 0xce4   :  { %v2657_v48 = vcombine.high %v2582_v18, %v5057_v34  ;;  %v2664_v23 = vrot.slane %v2582_v18, %v5242_v54 }
 0xce5   :  { %v2645_v49 = vrot.slane %v2637_v45, %v5248_v60  ;;  %v2652_v52 = vrot.slane %v2638_v46, %v5248_v60  ;;  %v2723_v53 = vcombine.low %v2629_v43, %v2636_v44  ;;  %v4592_v39 = vcombine.high %v2629_v43, %v2636_v44 }
 0xce6   :  { %v2671_v56 = vrot.slane %v2657_v48, %v5242_v54  ;;  %v2687_v32 = vcombine.low %v2664_v23, %v2679_v47  ;;  %v2688_v40 = vcombine.high %v2664_v23, %v2679_v47  ;;  %v2338_v58 = vpop.permute.xlu1 %2337  ;;  %v2512_v44 = vrot.slane %v2505_v29, %v5248_v60 }
 0xce7   :  { %v2730_v59 = vrot.slane %v2723_v53, %v5242_v54  ;;  %v2738_v61 = vrot.slane %v4592_v39, %v5242_v54  ;;  %v2739_v62 = vcombine.low %v2645_v49, %v2652_v52  ;;  %v4593_v63 = vcombine.high %v2645_v49, %v2652_v52 }
 0xce8   :  { %v2695_v0 = vrot.slane %v2687_v32, %v5248_v60  ;;  %v2702_v1 = vrot.slane %v2688_v40, %v5248_v60  ;;  %v2703_v2 = vcombine.low %v2671_v56, %v2686_v57  ;;  %v2704_v3 = vcombine.high %v2671_v56, %v2686_v57 }
 0xce9   :  { %v2746_v4 = vrot.slane %v2739_v62, %v5242_v54  ;;  %v2754_v5 = vrot.slane %v4593_v63, %v5242_v54  ;;  %v2755_v6 = vcombine.low %v2730_v59, %v2738_v61  ;;  %v2422_v7 = vcombine.high %v2338_v58, %v5057_v34 }
 0xcea   :  { %v2711_v8 = vrot.slane %v2703_v2, %v5248_v60  ;;  %v2718_v9 = vrot.slane %v2704_v3, %v5248_v60  ;;  %v2773_v10 = vcombine.low %v2695_v0, %v2702_v1  ;;  %v4594_v11 = vcombine.high %v2695_v0, %v2702_v1  ;;  %v5031_v2 = vld [vmem:[%s5981_s30] ss:$0 sm:$0xff] }
 0xceb   :  { %v2762_v12 = vrot.slane %v2755_v6, %v5248_v60  ;;  %v2763_v13 = vcombine.low %v2746_v4, %v2754_v5  ;;  %v2429_v14 = vrot.slane %v2338_v58, %v5242_v54  ;;  %v2436_v15 = vrot.slane %v2422_v7, %v5242_v54  ;;  %v5032_v7 = vld [vmem:[%s5981_s30 + $0x1] ss:$0 sm:$0xff] }
 0xcec   :  { %v2780_v16 = vrot.slane %v2773_v10, %v5242_v54  ;;  %v2788_v19 = vrot.slane %v4594_v11, %v5242_v54  ;;  %v2789_v20 = vcombine.low %v2711_v8, %v2718_v9  ;;  %v4595_v21 = vcombine.high %v2711_v8, %v2718_v9  ;;  %v5033_v11 = vld [vmem:[%s5981_s30 + $0x2] ss:$0 sm:$0xff] }
 0xced   :  { %v2437_v22 = vcombine.low %v2414_v37, %v2429_v14  ;;  %v2438_v17 = vcombine.high %v2414_v37, %v2429_v14  ;;  %v2453_v24 = vcombine.low %v2421_v36, %v2436_v15  ;;  %v2454_v33 = vcombine.high %v2421_v36, %v2436_v15 }
 0xcee   :  { %v2796_v31 = vrot.slane %v2789_v20, %v5242_v54  ;;  %v2804_v25 = vrot.slane %v4595_v21, %v5242_v54  ;;  %v2805_v26 = vcombine.low %v2780_v16, %v2788_v19  ;;  %v2770_v27 = vrot.slane %v2763_v13, %v5248_v60  ;;  %v5034_v16 = vld [vmem:[%s5981_s30 + $0x3] ss:$0 sm:$0xff] }
 0xcef   :  { %v2445_v28 = vrot.slane %v2437_v22, %v5248_v60  ;;  %v2452_v30 = vrot.slane %v2438_v17, %v5248_v60  ;;  %v2461_v18 = vrot.slane %v2453_v24, %v5248_v60  ;;  %v2468_v43 = vrot.slane %v2454_v33, %v5248_v60 }
 0xcf0   :  { %v2813_v37 = vcombine.low %v2796_v31, %v2804_v25  ;;  %v2771_v45 = vcombine.low %v2762_v12, %v2770_v27  ;;  %v2812_v23 = vrot.slane %v2805_v26, %v5248_v60  ;;  %v2521_v49 = vcombine.low %v2512_v44, %v5636_v35 }
 0xcf1   :  { %v2523_v36 = vcombine.low %v2445_v28, %v2452_v30  ;;  %v4590_v46 = vcombine.high %v2445_v28, %v2452_v30  ;;  %v2539_v47 = vcombine.low %v2461_v18, %v2468_v43  ;;  %v4591_v48 = vcombine.high %v2461_v18, %v2468_v43 }
 0xcf2   :  { %4858 = vmatpush3.xpose.msk.msra.mxu1 %vm970_vm2, %v2771_v45  ;;  %v2820_v52 = vrot.slane %v2813_v37, %v5248_v60  ;;  %v2772_v56 = vcombine.high %v2762_v12, %v2770_v27  ;;  %v2522_v61 = vcombine.high %v2512_v44, %v5636_v35 }
 0xcf3   :  { %v2530_v53 = vrot.slane %v2523_v36, %v5242_v54  ;;  %v2538_v39 = vrot.slane %v4590_v46, %v5242_v54  ;;  %v2546_v29 = vrot.slane %v2539_v47, %v5242_v54  ;;  %v2554_v57 = vrot.slane %v4591_v48, %v5242_v54  ;;  %4862 = vmatprep.subr.mxu1 %v5057_v34 }
 0xcf4   :  { %v2821_v32 = vcombine.low %v2812_v23, %v2820_v52  ;;  %v2822_v63 = vcombine.high %v2812_v23, %v2820_v52 }
 0xcf5   :  { %v2555_v40 = vcombine.low %v2530_v53, %v2538_v39  ;;  %v2563_v58 = vcombine.low %v2546_v29, %v2554_v57  ;;  %4860 = vmatmul.mubr.msk.f32.vlgmr.msra.gmra.mxu1 %vm970_vm2, %v2521_v49 }
 0xcf6   :  { %4863 = vmatpush3.xpose.msk.msra.mxu1 %vm970_vm2, %v2772_v56  ;;  %4868 = vmatpush3.xpose.msk.msra.mxu0 %vm970_vm2, %v2821_v32 }
 0xcf7   :  { %v2562_v59 = vrot.slane %v2555_v40, %v5248_v60  ;;  %4864 = vmatprep.mubr.msk.f32.mxu1 %vm5060_vm1, %v5057_v34  ;;  %4872 = vmatprep.subr.mxu1 %v5057_v34  ;;  %v2570_v62 = vrot.slane %v2563_v58, %v5248_v60 }
 0xcf8   :  { %4877 = vmatprep.subr.mxu0 %v5057_v34 }
 0xcf9   :  { %4865 = vmatmul.mubr.msk.f32.vlgmr.msra.gmra.mxu1 %vm970_vm2, %v2522_v61  ;;  %v2571_v0 = vcombine.low %v2562_v59, %v2570_v62  ;;  %v2572_v1 = vcombine.high %v2562_v59, %v2570_v62 }
 0xcfa   :  { %4873 = vmatpush3.xpose.msk.msra.mxu1 %vm970_vm2, %v2822_v63  ;;  %4874 = vmatprep.mubr.msk.f32.mxu1 %vm5060_vm1, %v5057_v34 }
 0xcfb   :  { %4870 = vmatmul.mubr.msk.f32.vlgmr.msra.gmra.mxu0 %vm970_vm2, %v2571_v0  ;;  %4882 = vmatprep.subr.mxu1 %v5057_v34 }
 0xcfc   :  { %4879 = vmatprep.mubr.msk.f32.mxu0 %vm5060_vm1, %v5057_v34 }
 0xcfd   :  { %4875 = vmatmul.mubr.msk.f32.vlgmr.msra.gmra.mxu1 %vm970_vm2, %v2572_v1 }
 0xcfe   :  { %4884 = vmatprep.mubr.msk.f32.mxu1 %vm5060_vm1, %v5057_v34 }
 0xdb5   :  { %v3139_v35 = vpop.f32.mrf.mxu1 }
 0xdb6   :  { %v3140_v3 = vadd.f32 %v5031_v2, %v3139_v35 }
 0xdb7   :  { %v4861_v4 = vpop.f32.mrf.mxu1 }
 0xdb8   :  { %v3371_v5 = vsel %vm1275_vm3, %v3140_v3, -inf }
 0xdb9   :  { %3372 = vmax.xlane.f32.xlu0 %v3371_v5  ;;  %v3215_v6 = vpop.f32.mrf.mxu1 }
 0xdba   :  { %v3216_v8 = vadd.f32 %v5032_v7, %v3215_v6 }
 0xdbb   :  { %v3291_v9 = vpop.f32.mrf.mxu0  ;;  %v4866_v10 = vpop.f32.mrf.mxu1 }
 0xdbc   :  { %v3292_v12 = vadd.f32 %v5033_v11, %v3291_v9  ;;  %v3374_v13 = vsel %vm1275_vm3, %v3216_v8, -inf }
 0xdbd   :  { %v4871_v14 = vpop.f32.mrf.mxu0  ;;  %3375 = vmax.xlane.f32.xlu1 %v3374_v13  ;;  %v3367_v15 = vpop.f32.mrf.mxu1 }
 0xdbe   :  { %v3368_v19 = vadd.f32 %v5034_v16, %v3367_v15  ;;  %v3377_v20 = vsel %vm1275_vm3, %v3292_v12, -inf }
 0xdbf   :  { %3378 = vmax.xlane.f32.xlu0 %v3377_v20  ;;  %v4876_v21 = vpop.f32.mrf.mxu1 }
 0xdc0   :  { %v3380_v22 = vsel %vm1275_vm3, %v3368_v19, -inf }
 0xdc3   :  { %3381 = vmax.xlane.f32.xlu0 %v3380_v22 }
 0xdce   :  { %2827 = vrot.lane.b32.xlu1 %v5592_v42, %s5063_s2 }
 0xdd2   :  { %2825 = vrot.lane.b32.xlu1 %v5576_v41, %s5063_s2 }
 0xe42   :  { %v3373_v17 = vpop.xlane.xlu0 %3372 }
 0xe43   :  { %v3383_v33 = vsub.f32 %v3140_v3, %v3373_v17 }
 0xe45   :  { %v3387_v28 = vmul.f32 1.442695, %v3383_v33 }
 0xe46   :  { %v3376_v24 = vpop.xlane.xlu1 %3375 }
 0xe47   :  { %v3384_v31 = vsub.f32 %v3216_v8, %v3376_v24 }
 0xe48   :  { %v3379_v25 = vpop.xlane.xlu0 %3378 }
 0xe49   :  { %v3389_v26 = vmul.f32 1.442695, %v3384_v31  ;;  %v3385_v27 = vsub.f32 %v3292_v12, %v3379_v25 }
 0xe4a   :  { %v2828_v23 = vpop.permute.xlu1 %2827 }
 0xe4b   :  { %5001 = vpow2.f32 %v3389_v26  ;;  %v3391_v30 = vmul.f32 1.442695, %v3385_v27  ;;  %v2850_v56 = vcombine.high %v2828_v23, %v5057_v34  ;;  %v2857_v62 = vrot.slane %v2828_v23, %v5242_v54 }
 0xe4c   :  { %v3382_v18 = vpop.xlane.xlu0 %3381 }
 0xe4d   :  { %5003 = vpow2.f32 %v3391_v30  ;;  %v3386_v43 = vsub.f32 %v3368_v19, %v3382_v18  ;;  %v2864_v3 = vrot.slane %v2850_v56, %v5242_v54 }
 0xe4e   :  { %5005 = vpow2.f32 %v3387_v28  ;;  %v2826_v49 = vpop.permute.xlu1 %2825 }
 0xe4f   :  { %v3393_v44 = vmul.f32 1.442695, %v3386_v43  ;;  %v2901_v57 = vcombine.high %v2826_v49, %v5057_v34  ;;  %v2908_v32 = vrot.slane %v2826_v49, %v5242_v54 }
 0xe51   :  { %5007 = vpow2.f32 %v3393_v44  ;;  %v2915_v63 = vrot.slane %v2901_v57, %v5242_v54 }
 0xe58   :  { %v5714_v42 = vpop.eup %5001 }
 0xe59   :  { %v3398_v41 = vsel %vm1275_vm3, %v5714_v42, 0.0 }
 0xe5a   :  { %v5718_v37 = vpop.eup %5003  ;;  %3399 = vadd.xlane.f32.xlu1 %v3398_v41 }
 0xe5b   :  { %v3401_v45 = vsel %vm1275_vm3, %v5718_v37, 0.0  ;;  %v5722_v36 = vpop.eup %5005 }
 0xe5c   :  { %3402 = vadd.xlane.f32.xlu0 %v3401_v45  ;;  %v3395_v47 = vsel %vm1275_vm3, %v5722_v36, 0.0 }
 0xe5e   :  { %v5724_v46 = vpop.eup %5007 }
 0xe5f   :  { %v3404_v48 = vsel %vm1275_vm3, %v5724_v46, 0.0 }
 0xe60   :  { %3396 = vadd.xlane.f32.xlu0 %v3395_v47  ;;  %3405 = vadd.xlane.f32.xlu1 %v3404_v48 }
 0xe71   :  { %2829 = vrot.lane.b32.xlu1 %v5588_v38, %s5063_s2 }
 0xe76   :  { %2823 = vrot.lane.b32.xlu0 %v5578_v55, %s5063_s2 }
 0xee3   :  { %v3400_v52 = vpop.xlane.xlu1 %3399 }
 0xee4   :  { %5009 = vrcp.f32 %v3400_v52 }
 0xee5   :  { %v3403_v53 = vpop.xlane.xlu0 %3402 }
 0xee6   :  { %5011 = vrcp.f32 %v3403_v53 }
 0xee9   :  { %v3406_v39 = vpop.xlane.xlu1 %3405  ;;  %v3397_v29 = vpop.xlane.xlu0 %3396 }
 0xeea   :  { %5013 = vrcp.f32 %v3397_v29 }
 0xeeb   :  { %5015 = vrcp.f32 %v3406_v39 }
 0xeed   :  { %v2830_v40 = vpop.permute.xlu1 %2829  ;;  %v2824_v58 = vpop.permute.xlu0 %2823 }
 0xeee   :  { %v2916_v38 = vcombine.high %v2830_v40, %v5057_v34  ;;  %v2923_v55 = vrot.slane %v2830_v40, %v5242_v54  ;;  %v2835_v59 = vcombine.high %v2824_v58, %v5057_v34  ;;  %v2842_v61 = vrot.slane %v2824_v58, %v5242_v54 }
 0xef0   :  { %v2930_v0 = vrot.slane %v2916_v38, %v5242_v54  ;;  %v2931_v1 = vcombine.low %v2908_v32, %v2923_v55  ;;  %v2932_v35 = vcombine.high %v2908_v32, %v2923_v55  ;;  %v2849_v2 = vrot.slane %v2835_v59, %v5242_v54 }
 0xef1   :  { %v2865_v4 = vcombine.low %v2842_v61, %v2857_v62  ;;  %v2866_v5 = vcombine.high %v2842_v61, %v2857_v62  ;;  %v5010_v44 = vpop.eup %5009  ;;  %v4619_v62 = vld [vmem:[%s5954_s6 + $0x38] sm:$0xff] }
 0xef2   :  { %v2939_v6 = vrot.slane %v2931_v1, %v5248_v60  ;;  %v2946_v7 = vrot.slane %v2932_v35, %v5248_v60  ;;  %v2947_v8 = vcombine.low %v2915_v63, %v2930_v0  ;;  %v2948_v9 = vcombine.high %v2915_v63, %v2930_v0 }
 0xef3   :  { %v2873_v10 = vrot.slane %v2865_v4, %v5248_v60  ;;  %v2880_v11 = vrot.slane %v2866_v5, %v5248_v60  ;;  %v2881_v12 = vcombine.low %v2849_v2, %v2864_v3  ;;  %v2882_v13 = vcombine.high %v2849_v2, %v2864_v3  ;;  %v5012_v48 = vpop.eup %5011 }
 0xef4   :  { %v2955_v14 = vrot.slane %v2947_v8, %v5248_v60  ;;  %v2962_v15 = vrot.slane %v2948_v9, %v5248_v60  ;;  %v3017_v16 = vcombine.low %v2939_v6, %v2946_v7  ;;  %v4598_v19 = vcombine.high %v2939_v6, %v2946_v7 }
 0xef5   :  { %v2889_v20 = vrot.slane %v2881_v12, %v5248_v60  ;;  %v2896_v21 = vrot.slane %v2882_v13, %v5248_v60  ;;  %v2967_v22 = vcombine.low %v2873_v10, %v2880_v11  ;;  %v4596_v17 = vcombine.high %v2873_v10, %v2880_v11 }
 0xef6   :  { %v3033_v24 = vcombine.low %v2955_v14, %v2962_v15  ;;  %v4599_v33 = vcombine.high %v2955_v14, %v2962_v15  ;;  %v3024_v28 = vrot.slane %v3017_v16, %v5242_v54  ;;  %v3032_v30 = vrot.slane %v4598_v19, %v5242_v54 }
 0xef7   :  { %v2974_v31 = vrot.slane %v2967_v22, %v5242_v54  ;;  %v2982_v25 = vrot.slane %v4596_v17, %v5242_v54  ;;  %v2983_v26 = vcombine.low %v2889_v20, %v2896_v21  ;;  %v4597_v27 = vcombine.high %v2889_v20, %v2896_v21  ;;  %v5014_v52 = vpop.eup %5013  ;;  %v4617_v17 = vld [vmem:[%s5954_s6 + $0x28] sm:$0xff] }
 0xef8   :  { %v3040_v18 = vrot.slane %v3033_v24, %v5242_v54  ;;  %v3048_v43 = vrot.slane %v4599_v33, %v5242_v54  ;;  %v3049_v53 = vcombine.low %v3024_v28, %v3032_v30  ;;  %v5016_v57 = vpop.eup %5015  ;;  %v3411_v58 = vmul.f32 %v5014_v52, %v5722_v36 }
 0xef9   :  { %v2990_v41 = vrot.slane %v2983_v26, %v5242_v54  ;;  %v2998_v45 = vrot.slane %v4597_v27, %v5242_v54  ;;  %v2999_v47 = vcombine.low %v2974_v31, %v2982_v25  ;;  %v3412_v38 = vmul.f32 %v5010_v44, %v5714_v42  ;;  %v4616_v26 = vld [vmem:[%s5954_s6 + $0x20] sm:$0xff] }
 0xefa   :  { %v3057_v23 = vcombine.low %v3040_v18, %v3048_v43  ;;  %v3056_v55 = vrot.slane %v3049_v53, %v5248_v60  ;;  %v3413_v36 = vmul.f32 %v5012_v48, %v5718_v37  ;;  %v3414_v42 = vmul.f32 %v5016_v57, %v5724_v46  ;;  %v4618_v37 = vld [vmem:[%s5954_s6 + $0x30] sm:$0xff] }
 0xefb   :  { %v3007_v49 = vcombine.low %v2990_v41, %v2998_v45  ;;  %v3006_v39 = vrot.slane %v2999_v47, %v5248_v60 }
 0xefc   :  { %v3064_v56 = vrot.slane %v3057_v23, %v5248_v60 }
 0xefd   :  { %v3014_v29 = vrot.slane %v3007_v49, %v5248_v60 }
 0xefe   :  { %v3065_v59 = vcombine.low %v3056_v55, %v3064_v56  ;;  %v3066_v61 = vcombine.high %v3056_v55, %v3064_v56 }
 0xeff   :  { %v3015_v32 = vcombine.low %v3006_v39, %v3014_v29  ;;  %v3016_v40 = vcombine.high %v3006_v39, %v3014_v29 }
 0xf01   :  { %4878 = vmatpush3.msra.mxu0 %v3015_v32  ;;  %4883 = vmatpush3.msra.mxu1 %v3016_v40 }
 0xf02   :  { %4880 = vmatmul.mubr.msk.f32.vlgmr.msra.gmra.mxu0 %vm1275_vm3, %v3411_v58  ;;  %4885 = vmatmul.mubr.msk.f32.vlgmr.msra.gmra.mxu1 %vm1275_vm3, %v3412_v38 }
 0xf03   :  { %4887 = vmatprep.subr.mxu0 %v5057_v34  ;;  %4892 = vmatprep.subr.mxu1 %v5057_v34 }
 0xf04   :  { %4888 = vmatpush3.msra.mxu0 %v3065_v59  ;;  %4893 = vmatpush3.msra.mxu1 %v3066_v61 }
 0xf05   :  { %4889 = vmatprep.mubr.msk.f32.mxu0 %vm5060_vm1, %v5057_v34  ;;  %4894 = vmatprep.mubr.msk.f32.mxu1 %vm5060_vm1, %v5057_v34 }
 0xf06   :  { %4890 = vmatmul.mubr.msk.f32.vlgmr.msra.gmra.mxu0 %vm1275_vm3, %v3413_v36  ;;  %4895 = vmatmul.mubr.msk.f32.vlgmr.msra.gmra.mxu1 %vm1275_vm3, %v3414_v42 }
 0xf07   :  { %4897 = vmatprep.subr.mxu0 %v4619_v62 }
 0xf08   :  { %4898 = vmatpush3.msra.mxu0 %v4619_v62 }
 0xf09   :  { %4899 = vmatprep.subr.mxu0 %v4618_v37 }
 0xf0a   :  { %4900 = vmatpush3.msra.mxu0 %v4618_v37 }
 0xf0b   :  { %4901 = vmatprep.subr.mxu0 %v4617_v17 }
 0xf0c   :  { %4902 = vmatpush3.msra.mxu0 %v4617_v17 }
 0xf0d   :  { %4903 = vmatprep.subr.mxu0 %v4616_v26 }
 0xf0e   :  { %4904 = vmatpush3.msra.mxu0 %v4616_v26  ;;  %v4628_v26 = vld [vmem:[%s5958_s10 + $0x20] sm:$0xff] }
 0xfc2   :  { %v3484_v46 = vpop.f32.mrf.mxu0  ;;  %v3557_v63 = vpop.f32.mrf.mxu1 }
 0xfc3   :  { %v3707_v0 = vcombine.high %v3484_v46, %v5057_v34  ;;  %v3714_v1 = vrot.slane %v3484_v46, %v5242_v54  ;;  %v3722_v35 = vcombine.high %v3557_v63, %v5057_v34  ;;  %v3729_v2 = vrot.slane %v3557_v63, %v5242_v54 }
 0xfc4   :  { %v4881_v3 = vpop.f32.mrf.mxu0  ;;  %v4886_v4 = vpop.f32.mrf.mxu1 }
 0xfc5   :  { %v3721_v5 = vrot.slane %v3707_v0, %v5242_v54  ;;  %v3736_v6 = vrot.slane %v3722_v35, %v5242_v54  ;;  %v3737_v7 = vcombine.low %v3714_v1, %v3729_v2  ;;  %v3738_v8 = vcombine.high %v3714_v1, %v3729_v2 }
 0xfc6   :  { %v3630_v9 = vpop.f32.mrf.mxu0  ;;  %v3703_v10 = vpop.f32.mrf.mxu1 }
 0xfc7   :  { %v3745_v11 = vrot.slane %v3737_v7, %v5248_v60  ;;  %v3752_v12 = vrot.slane %v3738_v8, %v5248_v60  ;;  %v3753_v13 = vcombine.low %v3721_v5, %v3736_v6  ;;  %v3754_v14 = vcombine.high %v3721_v5, %v3736_v6  ;;  %v4621_v7 = vld [vmem:[%s5955_s7 + $0x1] ss:$0 sm:$0xff] }
 0xfc8   :  { %v3773_v15 = vcombine.high %v3630_v9, %v5057_v34  ;;  %v3780_v16 = vrot.slane %v3630_v9, %v5242_v54  ;;  %v3788_v19 = vcombine.high %v3703_v10, %v5057_v34  ;;  %v3795_v20 = vrot.slane %v3703_v10, %v5242_v54  ;;  %v4891_v21 = vpop.f32.mrf.mxu0  ;;  %v4896_v22 = vpop.f32.mrf.mxu1 }
 0xfc9   :  { %v3761_v24 = vrot.slane %v3753_v13, %v5248_v60  ;;  %v3768_v33 = vrot.slane %v3754_v14, %v5248_v60  ;;  %v3839_v31 = vcombine.low %v3745_v11, %v3752_v12  ;;  %v4612_v25 = vcombine.high %v3745_v11, %v3752_v12 }
 0xfca   :  { %v3787_v27 = vrot.slane %v3773_v15, %v5242_v54  ;;  %v3802_v28 = vrot.slane %v3788_v19, %v5242_v54  ;;  %v3803_v30 = vcombine.low %v3780_v16, %v3795_v20  ;;  %v3804_v18 = vcombine.high %v3780_v16, %v3795_v20 }
 0xfcb   :  { %v3846_v43 = vrot.slane %v3839_v31, %v5242_v54  ;;  %v3854_v44 = vrot.slane %v4612_v25, %v5242_v54  ;;  %v3855_v41 = vcombine.low %v3761_v24, %v3768_v33  ;;  %v4613_v45 = vcombine.high %v3761_v24, %v3768_v33  ;;  %v4630_v31 = vld [vmem:[%s5958_s10 + $0x30] sm:$0xff]  ;;  %v4629_v25 = vld [vmem:[%s5958_s10 + $0x28] sm:$0xff] }
 0xfcc   :  { %v3811_v47 = vrot.slane %v3803_v30, %v5248_v60  ;;  %v3818_v48 = vrot.slane %v3804_v18, %v5248_v60  ;;  %v3819_v23 = vcombine.low %v3787_v27, %v3802_v28  ;;  %v3820_v49 = vcombine.high %v3787_v27, %v3802_v28 }
 0xfcd   :  { %v3862_v52 = vrot.slane %v3855_v41, %v5242_v54  ;;  %v3870_v53 = vrot.slane %v4613_v45, %v5242_v54  ;;  %v3871_v39 = vcombine.low %v3846_v43, %v3854_v44  ;;  %v4626_v45 = vld [vmem:[%s5956_s8 + $0x1] ss:$0 sm:$0xff] }
 0xfce   :  { %v3827_v29 = vrot.slane %v3819_v23, %v5248_v60  ;;  %v3834_v57 = vrot.slane %v3820_v49, %v5248_v60  ;;  %v3889_v56 = vcombine.low %v3811_v47, %v3818_v48  ;;  %v4614_v32 = vcombine.high %v3811_v47, %v3818_v48  ;;  %v4627_v48 = vld [vmem:[%s5957_s9 + $0x1] ss:$0 sm:$0xff] }
 0xfcf   :  { %v3879_v40 = vcombine.low %v3862_v52, %v3870_v53  ;;  %v3878_v61 = vrot.slane %v3871_v39, %v5248_v60 }
 0xfd0   :  { %v3896_v58 = vrot.slane %v3889_v56, %v5242_v54  ;;  %v3904_v38 = vrot.slane %v4614_v32, %v5242_v54  ;;  %v3905_v55 = vcombine.low %v3827_v29, %v3834_v57  ;;  %v4615_v59 = vcombine.high %v3827_v29, %v3834_v57  ;;  %v4643_v57 = vld [vmem:[%s5960_s12 + $0x78] sm:$0xff]  ;;  %v4642_v56 = vld [vmem:[%s5960_s12 + $0x70] sm:$0xff]  ;;  %v4641_v32 = vld [vmem:[%s5960_s12 + $0x68] sm:$0xff] }
 0xfd1   :  { %v3886_v36 = vrot.slane %v3879_v40, %v5248_v60  ;;  %4919 = vmatprep.subr.mxu0 %v4643_v57  ;;  %v4640_v40 = vld [vmem:[%s5960_s12 + $0x60] sm:$0xff] }
 0xfd2   :  { %v3912_v42 = vrot.slane %v3905_v55, %v5242_v54  ;;  %v3920_v62 = vrot.slane %v4615_v59, %v5242_v54  ;;  %v3921_v37 = vcombine.low %v3896_v58, %v3904_v38  ;;  %v4639_v58 = vld [vmem:[%s5960_s12 + $0x58] sm:$0xff]  ;;  %v4638_v38 = vld [vmem:[%s5960_s12 + $0x50] sm:$0xff]  ;;  %v4637_v55 = vld [vmem:[%s5960_s12 + $0x48] sm:$0xff] }
 0xfd3   :  { %v3888_v46 = vcombine.high %v3878_v61, %v3886_v36  ;;  %v3887_v63 = vcombine.low %v3878_v61, %v3886_v36  ;;  %v4636_v59 = vld [vmem:[%s5960_s12 + $0x40] sm:$0xff] }
 0xfd4   :  { %v3929_v0 = vcombine.low %v3912_v42, %v3920_v62  ;;  %v3928_v1 = vrot.slane %v3921_v37, %v5248_v60  ;;  %v4633_v61 = vld [vmem:[%s5959_s11 + $0x1] ss:$0 sm:$0xff] }
 0xfd5   :  { %3941 = vrot.lane.b32.xlu0 %v3888_v46, %s5064_s23 }
 0xfd6   :  { %v3936_v35 = vrot.slane %v3929_v0, %v5248_v60 }
 0xfd8   :  { %v3938_v2 = vcombine.high %v3928_v1, %v3936_v35  ;;  %v3937_v3 = vcombine.low %v3928_v1, %v3936_v35 }
 0xfda   :  { %3943 = vrot.lane.b32.xlu1 %v3938_v2, %s5064_s23 }
0x1047   :  { %v3942_v4 = vpop.permute.xlu0 %3941 }
0x1048   :  { %v3947_v5 = vsel %vm970_vm2, %v3887_v63, %v3942_v4 }
0x1049   :  { %4905 = vmatprep.mubr.msk.f32.mxu0 %vm74_vm0, %v3947_v5 }
0x104c   :  { %v3944_v54 = vpop.permute.xlu1 %3943 }
0x104d   :  { %v3948_v6 = vsel %vm970_vm2, %v3937_v3, %v3944_v54 }
0x104e   :  { %4906 = vmatmul.mubr.msk.f32.vlgmr.msra.gmra.mxu0 %vm74_vm0, %v3948_v6  ;;  %v4645_v6 = vld [vmem:[%s5961_s13 + $0x1] ss:$0 sm:$0xff] }
0x104f   :  { %4920 = vmatpush3.msra.mxu0 %v4643_v57 }
0x1050   :  { %4921 = vmatprep.subr.mxu0 %v4642_v56 }
0x1051   :  { %4922 = vmatpush3.msra.mxu0 %v4642_v56  ;;  %v4433_v56 = vld [vmem:[%s5966_s18 + $0x18] sm:$0xff] }
0x1052   :  { %4923 = vmatprep.subr.mxu0 %v4641_v32 }
0x1053   :  { %4924 = vmatpush3.msra.mxu0 %v4641_v32  ;;  %v4432_v32 = vld [vmem:[%s5966_s18 + $0x10] sm:$0xff] }
0x1054   :  { %4925 = vmatprep.subr.mxu0 %v4640_v40 }
0x1055   :  { %4926 = vmatpush3.msra.mxu0 %v4640_v40  ;;  %v4431_v40 = vld [vmem:[%s5966_s18 + $0x8] sm:$0xff] }
0x1056   :  { %4927 = vmatprep.subr.mxu0 %v4639_v58 }
0x1057   :  { %4928 = vmatpush3.msra.mxu0 %v4639_v58  ;;  %v4430_v58 = vld [vmem:[%s5966_s18] sm:$0xff]  ;;  %s5065_s18 = smov [#allocation2]  }
0x1058   :  { %4929 = vmatprep.subr.mxu0 %v4638_v38  ;;  %s4522_s30 = sshll.u32 %s5065_s18, 4  ;;  %s4523_s30 = int_to_ptr.vmem [resolvable:$true] %s4522_s30 }
0x1059   :  { %4930 = vmatpush3.msra.mxu0 %v4638_v38  ;;  %v4652_v38 = vld [vmem:[%s5965_s17] ss:$0 sm:$0xff]  ;;  %s5035_s17 = scalar_lea.vmem %s4523_s30, 32  ;;  %p5040_p1 = scmp.lt.s32.totalorder %s4523_s30, %s4523_s30 }
0x105a   :  { %4931 = vmatprep.subr.mxu0 %v4637_v55  ;;  %p5036_p0 = scmp.ne.s32.totalorder %s4523_s30, %s5035_s17  ;;  %p5041_p2 = scmp.lt.s32.totalorder %s5035_s17, %s5035_s17 }
0x105b   :  { %4932 = vmatpush3.msra.mxu0 %v4637_v55 }
0x105c   :  { %4933 = vmatprep.subr.mxu0 %v4636_v59  ;;  %p5042_p3 = por %p5041_p2, %p5040_p1 }
0x105d   :  { %4934 = vmatpush3.msra.mxu0 %v4636_v59 }
0x105e   :  { %p5043_p4 = pnand %p5042_p3, %p5036_p0 }
0x110e   :  { %v4907_v8 = vpop.f32.mrf.mxu0 }
0x110f   :  { %v4040_v60 = vadd.f32 %v4907_v8, %v4621_v7 }
0x1110   :  { %v4034_v9 = vpop.f32.mrf.mxu0 }
0x1111   :  { %v4035_v10 = vadd.f32 %v4621_v7, %v4034_v9  ;;  %v4044_v11 = vadd.f32 %v4040_v60, %v5565_v51 }
0x1113   :  { %v4052_v12 = vsel %vm74_vm0, %v4044_v11, 0.0  ;;  %v4043_v13 = vadd.f32 %v4035_v10, %v5563_v50  ;;  %v4631_v50 = vld [vmem:[%s5958_s10 + $0x38] sm:$0xff] }
0x1114   :  { %4053 = vadd.xlane.f32.xlu1 %v4052_v12  ;;  %4908 = vmatprep.subr.mxu1 %v4631_v50 }
0x1115   :  { %v4049_v14 = vsel %vm74_vm0, %v4043_v13, 0.0  ;;  %4909 = vmatpush3.msra.mxu1 %v4631_v50  ;;  %v4343_v50 = vld [vmem:[%s5964_s16 + $0x10] sm:$0xff] }
0x1116   :  { %4050 = vadd.xlane.f32.xlu0 %v4049_v14  ;;  %4910 = vmatprep.subr.mxu1 %v4630_v31 }
0x1117   :  { %4911 = vmatpush3.msra.mxu1 %v4630_v31  ;;  %v4342_v31 = vld [vmem:[%s5964_s16 + $0x8] sm:$0xff] }
0x1118   :  { %4912 = vmatprep.subr.mxu1 %v4629_v25 }
0x1119   :  { %4913 = vmatpush3.msra.mxu1 %v4629_v25  ;;  %v4341_v25 = vld [vmem:[%s5964_s16] sm:$0xff] }
0x111a   :  { %4914 = vmatprep.subr.mxu1 %v4628_v26 }
0x111b   :  { %4915 = vmatpush3.msra.mxu1 %v4628_v26 }
0x111c   :  { %4938 = vmatprep.subr.mxu1 %v5057_v34 }
0x119d   :  { %v4054_v15 = vpop.xlane.xlu1 %4053 }
0x119e   :  { %v4056_v16 = vmul.f32 0.03125, %v4054_v15 }
0x119f   :  { %v4051_v19 = vpop.xlane.xlu0 %4050 }
0x11a0   :  { %v4055_v20 = vmul.f32 0.03125, %v4051_v19  ;;  %v4058_v21 = vsub.f32 %v4044_v11, %v4056_v16 }
0x11a2   :  { %v4057_v22 = vsub.f32 %v4043_v13, %v4055_v20  ;;  %v4060_v33 = vmul.f32 %v4058_v21, %v4058_v21 }
0x11a4   :  { %v4059_v17 = vmul.f32 %v4057_v22, %v4057_v22  ;;  %v4064_v51 = vsel %vm74_vm0, %v4060_v33, 0.0 }
0x11a6   :  { %v4061_v24 = vsel %vm74_vm0, %v4059_v17, 0.0 }
0x11a7   :  { %4062 = vadd.xlane.f32.xlu0 %v4061_v24 }
0x11ab   :  { %4065 = vadd.xlane.f32.xlu0 %v4064_v51  ;;  %v4344_v51 = vld [vmem:[%s5964_s16 + $0x18] sm:$0xff] }
0x1230   :  { %v4063_v27 = vpop.xlane.xlu0 %4062 }
0x1231   :  { %v4067_v28 = vmul.f32 0.03125, %v4063_v27 }
0x1233   :  { %v4069_v30 = vadd.f32 1e-05, %v4067_v28 }
0x1234   :  { %v4066_v18 = vpop.xlane.xlu0 %4065 }
0x1235   :  { %5017 = vrsqrt.f32 %v4069_v30  ;;  %v4068_v43 = vmul.f32 0.03125, %v4066_v18 }
0x1237   :  { %v4070_v44 = vadd.f32 1e-05, %v4068_v43 }
0x1239   :  { %5019 = vrsqrt.f32 %v4070_v44 }
0x1242   :  { %v5018_v41 = vpop.eup %5017 }
0x1243   :  { %v4073_v47 = vmul.f32 %v5018_v41, %v4057_v22  ;;  %v4650_v41 = vld [vmem:[%s5962_s14 + $0x1] ss:$0 sm:$0xff] }
0x1245   :  { %v4081_v23 = vmul.f32 %v4626_v45, %v4073_v47 }
0x1246   :  { %v5020_v49 = vpop.eup %5019 }
0x1247   :  { %v4074_v52 = vmul.f32 %v5020_v49, %v4058_v21  ;;  %v4089_v53 = vadd.f32 %v4627_v48, %v4081_v23 }
0x1249   :  { %v4082_v39 = vmul.f32 %v4626_v45, %v4074_v52  ;;  %4916 = vmatprep.mubr.msk.f32.mxu1 %vm74_vm0, %v4089_v53 }
0x124b   :  { %v4090_v29 = vadd.f32 %v4627_v48, %v4082_v39  ;;  %v4651_v48 = vld [vmem:[%s5963_s15 + $0x1] ss:$0 sm:$0xff] }
0x124d   :  { %4917 = vmatmul.mubr.msk.f32.vlgmr.msra.gmra.mxu1 %vm74_vm0, %v4090_v29 }
0x124e   :  { %4946 = vmatprep.mubr.msk.f32.mxu1 %vm5060_vm1, %v5057_v34  ;;  %4939 = vmatpush3.msra.mxu1 %v4344_v51 }
0x124f   :  { %4940 = vmatprep.subr.mxu1 %v5057_v34 }
0x1250   :  { %4941 = vmatpush3.msra.mxu1 %v4343_v50 }
0x1251   :  { %4942 = vmatprep.subr.mxu1 %v5057_v34 }
0x1252   :  { %4943 = vmatpush3.msra.mxu1 %v4342_v31 }
0x1253   :  { %4944 = vmatprep.subr.mxu1 %v5057_v34 }
0x1254   :  { %4945 = vmatpush3.msra.mxu1 %v4341_v25 }
0x1255   :  { %4949 = vmatprep.subr.mxu1 %v5057_v34 }
0x130d   :  { %v4918_v36 = vpop.f32.mrf.mxu1 }
0x130e   :  { %v4182_v42 = vadd.f32 %v4918_v36, %v4633_v61 }
0x130f   :  { %v4176_v62 = vpop.f32.mrf.mxu1 }
0x1310   :  { %v4188_v37 = vmul.f32 0.70710677, %v4182_v42  ;;  %v4177_v46 = vadd.f32 %v4633_v61, %v4176_v62  ;;  %v4186_v4 = vmul.f32 0.5, %v4182_v42  ;;  %v4654_v42 = vld [vmem:[%s5967_s19] ss:$0 sm:$0xff] }
0x1312   :  { %5021 = verf.f32 %v4188_v37  ;;  %v4187_v63 = vmul.f32 0.70710677, %v4177_v46  ;;  %v4185_v2 = vmul.f32 0.5, %v4177_v46 }
0x1314   :  { %5023 = verf.f32 %v4187_v63 }
0x131f   :  { %v5022_v0 = vpop.eup %5021 }
0x1320   :  { %v4192_v35 = vadd.f32 1.0, %v5022_v0 }
0x1321   :  { %v5024_v1 = vpop.eup %5023 }
0x1322   :  { %v4191_v3 = vadd.f32 1.0, %v5024_v1  ;;  %v4194_v54 = vmul.f32 %v4192_v35, %v4186_v4 }
0x1324   :  { %v4193_v5 = vmul.f32 %v4191_v3, %v4185_v2 }
0x1326   :  { %4935 = vmatprep.mubr.msk.f32.mxu0 %vm2109_vm4, %v4193_v5 }
0x1327   :  { %4936 = vmatmul.mubr.msk.f32.vlgmr.msra.gmra.mxu0 %vm2109_vm4, %v4194_v54 }
0x13e7   :  { %v4937_v7 = vpop.f32.mrf.mxu0 }
0x13e8   :  { %v4290_v8 = vadd.f32 %v4937_v7, %v4645_v6 }
0x13e9   :  { %v4284_v60 = vpop.f32.mrf.mxu0 }
0x13ea   :  { %v4285_v9 = vadd.f32 %v4645_v6, %v4284_v60  ;;  %v4294_v10 = vadd.f32 %v4290_v8, %v4090_v29 }
0x13ec   :  { %v4302_v11 = vsel %vm74_vm0, %v4294_v10, 0.0  ;;  %v4293_v12 = vadd.f32 %v4285_v9, %v4089_v53 }
0x13ed   :  { %4303 = vadd.xlane.f32.xlu0 %v4302_v11 }
0x13ee   :  { %v4299_v13 = vsel %vm74_vm0, %v4293_v12, 0.0 }
0x13ef   :  { %4300 = vadd.xlane.f32.xlu1 %v4299_v13 }
0x1476   :  { %v4304_v14 = vpop.xlane.xlu0 %4303 }
0x1477   :  { %v4306_v15 = vmul.f32 0.03125, %v4304_v14 }
0x1478   :  { %v4301_v16 = vpop.xlane.xlu1 %4300 }
0x1479   :  { %v4308_v19 = vsub.f32 %v4294_v10, %v4306_v15  ;;  %v4305_v20 = vmul.f32 0.03125, %v4301_v16 }
0x147b   :  { %v4307_v21 = vsub.f32 %v4293_v12, %v4305_v20  ;;  %v4310_v22 = vmul.f32 %v4308_v19, %v4308_v19 }
0x147d   :  { %v4314_v17 = vsel %vm74_vm0, %v4310_v22, 0.0  ;;  %v4309_v24 = vmul.f32 %v4307_v21, %v4307_v21 }
0x147e   :  { %4315 = vadd.xlane.f32.xlu0 %v4314_v17 }
0x147f   :  { %v4311_v33 = vsel %vm74_vm0, %v4309_v24, 0.0 }
0x1480   :  { %4312 = vadd.xlane.f32.xlu1 %v4311_v33 }
0x1507   :  { %v4316_v26 = vpop.xlane.xlu0 %4315 }
0x1508   :  { %v4318_v27 = vmul.f32 0.03125, %v4316_v26 }
0x1509   :  { %v4313_v28 = vpop.xlane.xlu1 %4312 }
0x150a   :  { %v4320_v30 = vadd.f32 1e-05, %v4318_v27  ;;  %v4317_v18 = vmul.f32 0.03125, %v4313_v28 }
0x150c   :  { %5025 = vrsqrt.f32 %v4320_v30  ;;  %v4319_v43 = vadd.f32 1e-05, %v4317_v18 }
0x150e   :  { %5027 = vrsqrt.f32 %v4319_v43 }
0x1519   :  { %v5026_v44 = vpop.eup %5025 }
0x151a   :  { %v4324_v45 = vmul.f32 %v5026_v44, %v4308_v19 }
0x151b   :  { %v5028_v47 = vpop.eup %5027 }
0x151c   :  { %v4323_v23 = vmul.f32 %v5028_v47, %v4307_v21  ;;  %v4332_v49 = vmul.f32 %v4650_v41, %v4324_v45 }
0x151e   :  { %v4331_v52 = vmul.f32 %v4650_v41, %v4323_v23  ;;  %v4340_v53 = vadd.f32 %v4651_v48, %v4332_v49 }
0x1520   :  { %v4339_v39 = vadd.f32 %v4651_v48, %v4331_v52  ;;  %v4354_v29 = vrot.slane %v4340_v53, 7 }
0x1522   :  { %v4356_v57 = vsel %vm4355_vm5, %v4354_v29, %v4339_v39 }
0x1523   :  { %4947 = vmatmul.mubr.msk.f32.vlgmr.msra.gmra.mxu1 %vm74_vm0, %v4356_v57 }
0x1524   :  { %4957 = vmatprep.mubr.msk.f32.mxu1 %vm5060_vm1, %v5057_v34  ;;  %4950 = vmatpush3.msra.mxu1 %v4433_v56 }
0x1525   :  { %4951 = vmatprep.subr.mxu1 %v5057_v34 }
0x1526   :  { %4952 = vmatpush3.msra.mxu1 %v4432_v32 }
0x1527   :  { %4953 = vmatprep.subr.mxu1 %v5057_v34 }
0x1528   :  { %4954 = vmatpush3.msra.mxu1 %v4431_v40 }
0x1529   :  { %4955 = vmatprep.subr.mxu1 %v5057_v34 }
0x152a   :  { %4956 = vmatpush3.msra.mxu1 %v4430_v58 }
0x15e3   :  { %v4425_v55 = vpop.f32.mrf.mxu1 }
0x15e4   :  { %v4426_v59 = vadd.f32 %v4652_v38, %v4425_v55 }
0x15e5   :  { %v4948_v61 = vpop.f32.mrf.mxu1 }
0x15e6   :  { %5029 = vtanh.f32 %v4426_v59 }
0x15f3   :  { %v5030_v36 = vpop.eup %5029 }
0x15f4   :  { %4958 = vmatmul.mubr.msk.f32.vlgmr.msra.gmra.mxu1 %vm74_vm0, %v5030_v36 }
0x16b4   :  { %v4510_v62 = vpop.f32.mrf.mxu1 }
0x16b5   :  { %v4511_v34 = vadd.f32 %v4654_v42, %v4510_v62 }
0x16b6   :  { %v4959_v37 = vpop.f32.mrf.mxu1 }
0x16b7   :  { %4515 = vst.msk [vmem:[#allocation2] sm:$0x3] %vm4514_vm6, %v4511_v34 }
0x16b8   :  { %5046 = shalt.err (!%p5043_p4)
}
0x16b9   :  { %4525 = dma.vmem_to_hbm [thread:$0]  %s4523_s30, 32, %s5968_s20, [#allocation3]  }
0x16ba   :  { %5055 = dma.done.wait [#allocation3], 32  }
0x16bb   :  { %5056 = vsyncadd [#allocation3], 4294967264 }
0x16bc   :  { %4529 = vsyncpa [#allocation3], 1 }

</bundles_post_ra>
